<compile_context>
chip_gen: v6e
topology: v6e:2x2x1
jax: 0.10.0
libtpu: 0.0.40
codegen_flags: <defaults>
</compile_context>

<pallas_src>
import jax
import jax.numpy as jnp
from jax.experimental import pallas as pl
from jax.experimental.pallas import tpu as pltpu

BN_EPS = 1e-5
LANE = 128


def seghead_kernel(x_ref, w1_ref, w2_ref, aux_ref, o_ref):
    cmid = w1_ref.shape[-1]
    ncp = o_ref.shape[-1]
    # Packed per-channel vectors: row0 = w1 dequant scale, row1 = folded BN
    # bias, row2 = w2 dequant scale, row3 = conv2 bias (rows 2/3 use ncp lanes).
    s1 = aux_ref[0:1, :cmid]
    b1 = aux_ref[1:2, :cmid]
    s2 = aux_ref[2:3, :ncp]
    b2 = aux_ref[3:4, :ncp]

    # conv1: 3x3 center tap on a 1x1 input == matmul.  int8 -> bf16 cast is
    # exact; per-output-channel dequant scale (BN scale already folded into the
    # quantized weight) is applied to the tiny (B, Cmid) matmul result.
    w1 = w1_ref[...].astype(jnp.bfloat16)
    h = jnp.dot(x_ref[...], w1, preferred_element_type=jnp.float32)
    h = jnp.maximum(h * s1 + b1, 0.0)            # BN shift + ReLU
    # Dropout(0.1) in eval mode is identity.

    # conv2: 1x1 conv == matmul + bias (lane-padded output width).
    w2 = w2_ref[...].astype(jnp.bfloat16)
    y = jnp.dot(h.astype(jnp.bfloat16), w2, preferred_element_type=jnp.float32)
    o_ref[...] = (y * s2 + b2).astype(o_ref.dtype)


def _quantize_per_col(w):
    """Symmetric per-output-channel (column) int8 quantization."""
    amax = jnp.max(jnp.abs(w), axis=0, keepdims=True)          # (1, C)
    scale = jnp.maximum(amax, 1e-30) / 127.0
    w_i8 = jnp.clip(jnp.round(w / scale), -127, 127).astype(jnp.int8)
    return w_i8, scale.astype(jnp.float32)


def fold_bn_quantize_pack(params):
    """One-time wrapper-side prep.

    Folds eval-mode BatchNorm into conv1, quantizes both weight matrices to
    int8 (per-output-channel scales), lane-pads conv2 to a multiple of 128
    classes, and packs the four small per-channel vectors into one buffer.

    Returns (w1_i8, w2_i8, aux, ncp).
    """
    w1, gamma, beta, mean, var, w2, b2 = params
    bn_scale = gamma * jax.lax.rsqrt(var + BN_EPS)              # (1, Cmid)
    w1_folded = w1 * bn_scale                                   # (Cin, Cmid)
    b1_folded = (beta - mean * bn_scale).astype(jnp.float32)    # (1, Cmid)
    w1_i8, s1 = _quantize_per_col(w1_folded)

    nc = w2.shape[1]
    ncp = ((nc + LANE - 1) // LANE) * LANE
    w2_p = jnp.pad(w2, ((0, 0), (0, ncp - nc)))                 # (Cmid, NCp)
    b2_p = jnp.pad(b2, ((0, 0), (0, ncp - nc))).astype(jnp.float32)
    w2_i8, s2 = _quantize_per_col(w2_p)                         # padded cols -> 0

    cmid = w1_folded.shape[1]
    width = max(cmid, ncp)
    aux = jnp.zeros((4, width), jnp.float32)
    aux = aux.at[0, :cmid].set(s1[0])
    aux = aux.at[1, :cmid].set(b1_folded[0])
    aux = aux.at[2, :ncp].set(s2[0])
    aux = aux.at[3, :ncp].set(b2_p[0])
    return w1_i8, w2_i8, aux, ncp


def fcn_seghead_forward(x, packed, num_classes):
    """x: (B, Cin) float32.  Returns (B, num_classes, 1, 1) float32 (NCHW)."""
    w1_i8, w2_i8, aux, ncp = packed
    B, cin = x.shape
    cmid = w1_i8.shape[1]

    x_in = x.astype(jnp.bfloat16)        # 8 KiB of activations, negligible

    flops = 2 * B * cin * cmid + 2 * B * cmid * ncp
    bytes_accessed = int(
        x_in.size * 2            # bf16 activations
        + w1_i8.size * 1         # int8 w1 (dominant stream)
        + w2_i8.size * 1         # int8 w2
        + aux.size * 4           # packed scales/biases
        + B * ncp * 4            # f32 output
    )

    # Unblocked, single-buffered VMEM residency for every operand: no grid,
    # no dead double-buffer, one DMA per operand.
    vmem_spec = pl.BlockSpec(memory_space=pltpu.MemorySpace.VMEM)

    out = pl.pallas_call(
        seghead_kernel,
        out_shape=jax.ShapeDtypeStruct((B, ncp), jnp.float32),
        in_specs=[vmem_spec, vmem_spec, vmem_spec, vmem_spec],
        out_specs=vmem_spec,
        cost_estimate=pl.CostEstimate(
            flops=flops, transcendentals=0, bytes_accessed=bytes_accessed),
    )(x_in, w1_i8, w2_i8, aux)

    # Slice off lane padding and return NCHW (B, num_classes, 1, 1).
    # (A consumer that can handle the lane-padded (B, 128) slab could skip this.)
    return out[:, :num_classes].reshape(B, num_classes, 1, 1)


def init_params(key, in_channels, num_classes):
    """Deterministic synthetic parameters matching FCNHead(2048, num_classes) shapes."""
    inter = in_channels // 4
    k1, k2, k3 = jax.random.split(key, 3)
    # Conv2d(in, inter, 3, padding=1, bias=False): weight (inter, in, 3, 3)
    conv1_w = jax.random.normal(k1, (inter, in_channels, 3, 3), jnp.float32) * 0.02
    # Only the center tap contributes for a 1x1 spatial input with pad=1.
    w1 = jnp.transpose(conv1_w[:, :, 1, 1], (1, 0))            # (Cin, Cmid)
    # BatchNorm2d default init / running stats
    gamma = jnp.ones((1, inter), jnp.float32)
    beta = jnp.zeros((1, inter), jnp.float32)
    running_mean = jnp.zeros((1, inter), jnp.float32)
    running_var = jnp.ones((1, inter), jnp.float32)
    # Conv2d(inter, num_classes, 1): weight (NC, inter, 1, 1), bias (NC,)
    conv2_w = jax.random.normal(k2, (num_classes, inter, 1, 1), jnp.float32) * 0.02
    w2 = jnp.transpose(conv2_w[:, :, 0, 0], (1, 0))            # (Cmid, NC)
    b2 = (jax.random.normal(k3, (num_classes,), jnp.float32) * 0.01).reshape(1, -1)
    return (w1, gamma, beta, running_mean, running_var, w2, b2)


def reference_forward_f32(x, params):
    """Pure-JAX f32 reference matching the PyTorch module (eval mode)."""
    w1, gamma, beta, mean, var, w2, b2 = params
    h = x @ w1
    h = (h - mean) / jnp.sqrt(var + BN_EPS) * gamma + beta
    h = jnp.maximum(h, 0.0)
    y = h @ w2 + b2
    return y.reshape(x.shape[0], -1, 1, 1)


def reference_forward_quant(x, packed, num_classes):
    """Pure-JAX reference using the same int8/bf16 folded params as the kernel."""
    w1_i8, w2_i8, aux, ncp = packed
    cmid = w1_i8.shape[1]
    s1, b1 = aux[0:1, :cmid], aux[1:2, :cmid]
    s2, b2 = aux[2:3, :ncp], aux[3:4, :ncp]
    xb = x.astype(jnp.bfloat16)
    h = jnp.dot(xb, w1_i8.astype(jnp.bfloat16), preferred_element_type=jnp.float32)
    h = jnp.maximum(h * s1 + b1, 0.0)
    y = jnp.dot(h.astype(jnp.bfloat16), w2_i8.astype(jnp.bfloat16),
                preferred_element_type=jnp.float32) * s2 + b2
    return y[:, :num_classes].reshape(x.shape[0], num_classes, 1, 1)


if __name__ == "__main__":
    B = 2
    IN_CHANNELS = 2048      # fixed by fcn_resnet50's FCNHead
    NUM_CLASSES = 21

    key = jax.random.PRNGKey(0)
    kx, kp = jax.random.split(key)
    x = jax.random.normal(kx, (B, IN_CHANNELS), jnp.float32)
    params = init_params(kp, IN_CHANNELS, NUM_CLASSES)
    packed = fold_bn_quantize_pack(params)       # one-time wrapper-side prep

    y = jax.block_until_ready(fcn_seghead_forward(x, packed, NUM_CLASSES))
    assert y.shape == (B, NUM_CLASSES, 1, 1), y.shape

    # Tight check against a reference using identical int8/bf16 folded params.
    y_q = jax.block_until_ready(reference_forward_quant(x, packed, NUM_CLASSES))
    assert jnp.allclose(y, y_q, atol=1e-2, rtol=1e-2), float(jnp.max(jnp.abs(y - y_q)))

    # Looser check against the exact f32 module semantics (int8 weight quant).
    y_f32 = jax.block_until_ready(reference_forward_f32(x, params))
    assert jnp.allclose(y, y_f32, atol=5e-2, rtol=5e-2), float(jnp.max(jnp.abs(y - y_f32)))

    print("KERNEL_OK")
</pallas_src>

<mosaic_0001>
module attributes {stable_mosaic.version = 11 : i64} {
  func.func @seghead_kernel(%arg0: memref<2x2048xbf16, #tpu.memory_space<vmem>>, %arg1: memref<2048x512xi8, #tpu.memory_space<vmem>>, %arg2: memref<512x128xi8, #tpu.memory_space<vmem>>, %arg3: memref<4x512xf32, #tpu.memory_space<vmem>>, %arg4: memref<2x128xf32, #tpu.memory_space<vmem>>) attributes {dimension_semantics = [], scalar_prefetch = 0 : i64, scratch_operands = 0 : i64, tpu.core_type = #tpu.core_type<tc>} {
    %c0 = arith.constant 0 : index
    %c0_0 = arith.constant 0 : index
    %0 = vector.load %arg3[%c0, %c0_0] : memref<4x512xf32, #tpu.memory_space<vmem>>, vector<1x512xf32>
    %c1 = arith.constant 1 : index
    %c0_1 = arith.constant 0 : index
    %1 = vector.load %arg3[%c1, %c0_1] : memref<4x512xf32, #tpu.memory_space<vmem>>, vector<1x512xf32>
    %c2 = arith.constant 2 : index
    %c0_2 = arith.constant 0 : index
    %2 = vector.load %arg3[%c2, %c0_2] : memref<4x512xf32, #tpu.memory_space<vmem>>, vector<1x128xf32>
    %c3 = arith.constant 3 : index
    %c0_3 = arith.constant 0 : index
    %3 = vector.load %arg3[%c3, %c0_3] : memref<4x512xf32, #tpu.memory_space<vmem>>, vector<1x128xf32>
    %c0_4 = arith.constant 0 : index
    %c0_5 = arith.constant 0 : index
    %4 = vector.load %arg1[%c0_4, %c0_5] : memref<2048x512xi8, #tpu.memory_space<vmem>>, vector<2048x512xi8>
    %5 = arith.sitofp %4 : vector<2048x512xi8> to vector<2048x512xbf16>
    %c0_6 = arith.constant 0 : index
    %c0_7 = arith.constant 0 : index
    %6 = vector.load %arg0[%c0_6, %c0_7] : memref<2x2048xbf16, #tpu.memory_space<vmem>>, vector<2x2048xbf16>
    %cst = arith.constant dense<0.000000e+00> : vector<2x512xf32>
    %7 = tpu.matmul %6, %5, %cst {dimension_numbers = #tpu.dot_dimension_numbers<[1], [0], [0], [1], [0, 0, 1, 1], [], []>} : vector<2x2048xbf16>, vector<2048x512xbf16>, vector<2x512xf32> -> vector<2x512xf32>
    %8 = vector.broadcast %0 : vector<1x512xf32> to vector<2x512xf32>
    %9 = arith.mulf %7, %8 : vector<2x512xf32>
    %10 = vector.broadcast %1 : vector<1x512xf32> to vector<2x512xf32>
    %11 = arith.addf %9, %10 : vector<2x512xf32>
    %cst_8 = arith.constant 0.000000e+00 : f32
    %12 = vector.broadcast %cst_8 : f32 to vector<2x512xf32>
    %13 = arith.maximumf %11, %12 : vector<2x512xf32>
    %c0_9 = arith.constant 0 : index
    %c0_10 = arith.constant 0 : index
    %14 = vector.load %arg2[%c0_9, %c0_10] : memref<512x128xi8, #tpu.memory_space<vmem>>, vector<512x128xi8>
    %15 = arith.sitofp %14 : vector<512x128xi8> to vector<512x128xbf16>
    %16 = arith.truncf %13 : vector<2x512xf32> to vector<2x512xbf16>
    %cst_11 = arith.constant dense<0.000000e+00> : vector<2x128xf32>
    %17 = tpu.matmul %16, %15, %cst_11 {dimension_numbers = #tpu.dot_dimension_numbers<[1], [0], [0], [1], [0, 0, 1, 1], [], []>} : vector<2x512xbf16>, vector<512x128xbf16>, vector<2x128xf32> -> vector<2x128xf32>
    %18 = vector.broadcast %2 : vector<1x128xf32> to vector<2x128xf32>
    %19 = arith.mulf %17, %18 : vector<2x128xf32>
    %20 = vector.broadcast %3 : vector<1x128xf32> to vector<2x128xf32>
    %21 = arith.addf %19, %20 : vector<2x128xf32>
    %c0_12 = arith.constant 0 : index
    %c0_13 = arith.constant 0 : index
    %22 = vector.load %arg4[%c0_12, %c0_13] : memref<2x128xf32, #tpu.memory_space<vmem>>, vector<2x128xf32>
    tpu.vector_store %arg4[%c0_12, %c0_13], %21 {strides = array<i32>} : memref<2x128xf32, #tpu.memory_space<vmem>>, vector<2x128xf32>,
    return
  }
}

</mosaic_0001>

<bundles_post_ra>
// kernel: tpu_custom_call.1
= control target key start
LH: loop header
LB: loop body
LE: loop exit
PB: predicated region body
PF: predicated region fallthrough
CT: control target
= control target key end

     0   :  { %9 = vsyncpa [#allocation3], 0  ;;  %s2223_s0 = inlined_call_operand.hbm [shape: bf16[2,2048], index: 0, kind: input, shape index: {}]   ;;  %s2224_s1 = inlined_call_operand.hbm [shape: s8[2048,512], index: 1, kind: input, shape index: {}]   ;;  %s2225_s2 = inlined_call_operand.hbm [shape: s8[512,128], index: 2, kind: input, shape index: {}]   ;;  %s2226_s3 = inlined_call_operand.hbm [shape: f32[4,512], index: 3, kind: input, shape index: {}]   ;;  %s2227_s4 = inlined_call_operand.hbm [shape: f32[2,128], index: 4, kind: output, shape index: {}]  }
   0x1   :  { %10 = vsyncpa [#allocation6], 0 }
   0x2   :  { %11 = vsyncpa [#allocation9], 0 }
   0x3   :  { %12 = vsyncpa [#allocation4], 0  ;;  %s1997_s15 = smov [#allocation5]  }
   0x4   :  { %s28_s16 = sshll.u32 %s1997_s15, 4  ;;  %s29_s16 = int_to_ptr.vmem [resolvable:$true] %s28_s16 }
   0x5   :  { %s1897_s17 = scalar_lea.vmem %s29_s16, 32768  ;;  %p1902_p1 = scmp.lt.s32.totalorder %s29_s16, %s29_s16 }
   0x6   :  { %p1898_p0 = scmp.ne.s32.totalorder %s29_s16, %s1897_s17  ;;  %p1903_p2 = scmp.lt.s32.totalorder %s1897_s17, %s1897_s17 }
   0x8   :  { %p1904_p3 = por %p1903_p2, %p1902_p1 }
   0xa   :  { %p1905_p4 = pnand %p1904_p3, %p1898_p0 }
   0xc   :  { %1908 = shalt.err (!%p1905_p4)
}
   0xd   :  { %s1998_s18 = smov 512   ;;  %s1999_s19 = smov 32  }
   0xe   :  { %34 = dma.hbm_to_vmem [thread:$0]  %s2224_s1, 32768, %s29_s16, [#allocation6], %s1998_s18, %s1998_s18, %s1999_s19  }
   0xf   :  { %s2000_s22 = smov [#allocation2]   ;;  %s2001_s24 = smov [#allocation7]  }
  0x10   :  { %s19_s23 = sshll.u32 %s2000_s22, 4  ;;  %s40_s25 = sshll.u32 %s2001_s24, 4  ;;  %s20_s23 = int_to_ptr.vmem [resolvable:$true] %s19_s23  ;;  %s41_s25 = int_to_ptr.vmem [resolvable:$true] %s40_s25 }
  0x11   :  { %s1917_s26 = scalar_lea.vmem %s20_s23, 256  ;;  %p1922_p6 = scmp.lt.s32.totalorder %s20_s23, %s20_s23 }
  0x12   :  { %p1918_p5 = scmp.ne.s32.totalorder %s20_s23, %s1917_s26  ;;  %p1923_p7 = scmp.lt.s32.totalorder %s1917_s26, %s1917_s26 }
  0x14   :  { %p1924_p8 = por %p1923_p7, %p1922_p6 }
  0x16   :  { %p1925_p9 = pnand %p1924_p8, %p1918_p5 }
  0x18   :  { %1928 = shalt.err (!%p1925_p9)
}
  0x19   :  { %22 = dma.hbm_to_vmem [thread:$0]  %s2223_s0, 256, %s20_s23, [#allocation3]  }
  0x1a   :  { %s1937_s29 = scalar_lea.vmem %s41_s25, 2048  ;;  %p1942_p11 = scmp.lt.s32.totalorder %s41_s25, %s41_s25 }
  0x1b   :  { %p1938_p10 = scmp.ne.s32.totalorder %s41_s25, %s1937_s29  ;;  %p1943_p12 = scmp.lt.s32.totalorder %s1937_s29, %s1937_s29 }
  0x1d   :  { %p1944_p13 = por %p1943_p12, %p1942_p11 }
  0x1f   :  { %p1945_p0 = pnand %p1944_p13, %p1938_p10 }
  0x21   :  { %1948 = shalt.err (!%p1945_p0)
}
  0x22   :  { %s2002_s1 = smov 128   ;;  %s2003_s30 = smov 8  }
  0x23   :  { %46 = dma.hbm_to_vmem [thread:$0]  %s2225_s2, 2048, %s41_s25, [#allocation6], %s2002_s1, %s2002_s1, %s2003_s30  }
  0x24   :  { %s2004_s7 = smov [#allocation8]  }
  0x25   :  { %s53_s8 = sshll.u32 %s2004_s7, 4  ;;  %s54_s8 = int_to_ptr.vmem [resolvable:$true] %s53_s8 }
  0x26   :  { %s1957_s9 = scalar_lea.vmem %s54_s8, 256  ;;  %p1962_p2 = scmp.lt.s32.totalorder %s54_s8, %s54_s8 }
  0x27   :  { %p1958_p1 = scmp.ne.s32.totalorder %s54_s8, %s1957_s9  ;;  %p1963_p3 = scmp.lt.s32.totalorder %s1957_s9, %s1957_s9 }
  0x29   :  { %p1964_p4 = por %p1963_p3, %p1962_p2 }
  0x2b   :  { %p1965_p5 = pnand %p1964_p4, %p1958_p1 }
  0x2d   :  { %1968 = shalt.err (!%p1965_p5)
}
  0x2e   :  { %56 = dma.hbm_to_vmem [thread:$0]  %s2226_s3, 256, %s54_s8, [#allocation9]  }
  0x2f   :  { %1989 = dma.done.wait [#allocation3], 256  }
  0x30   :  { %1990 = vsyncadd [#allocation3], 4294967040 }
  0x31   :  { %1991 = dma.done.wait [#allocation6], 34816  }
  0x32   :  { %1992 = vsyncadd [#allocation6], 4294932480 }
  0x33   :  { %1993 = dma.done.wait [#allocation9], 256  }
  0x34   :  { %1994 = vsyncadd [#allocation9], 4294967040  ;;  %v88_v0 = vld [vmem:[#allocation5 + $0x68] sm:$0xff]  ;;  %v87_v2 = vld [vmem:[#allocation5 + $0x60] sm:$0xff]  ;;  %v2005_v18 = vmov 1966171168   ;;  %v851_v20 = vlaneseq }
  0x35   :  { %v120_v1 = vld [vmem:[#allocation5 + $0x168] sm:$0xff]  ;;  %v356_v3 = vunpack.c.l.s8.bf16 %v88_v0  ;;  %v360_v4 = vunpack.c.h.s8.bf16 %v88_v0  ;;  %v119_v7 = vld [vmem:[#allocation5 + $0x160] sm:$0xff]  ;;  %v359_v8 = vunpack.c.h.s8.bf16 %v87_v2  ;;  %v355_v12 = vunpack.c.l.s8.bf16 %v87_v2  ;;  %v2049_v36 = vld [vmem:[#allocation2] sm:$0xff]  ;;  %s2006_s2 = smov [#allocation10]  }
  0x36   :  { %v420_v5 = vunpack.c.l.s8.bf16 %v120_v1  ;;  %v424_v6 = vunpack.c.h.s8.bf16 %v120_v1  ;;  %v423_v9 = vunpack.c.h.s8.bf16 %v119_v7  ;;  %v84_v10 = vld [vmem:[#allocation5 + $0x48] sm:$0xff]  ;;  %v419_v13 = vunpack.c.l.s8.bf16 %v119_v7  ;;  %v83_v16 = vld [vmem:[#allocation5 + $0x40] sm:$0xff]  ;;  %s1820_s3 = sshll.u32 %s2006_s2, 4  ;;  %s1821_s3 = int_to_ptr.vmem [resolvable:$true] %s1820_s3 }
  0x37   :  { %v116_v11 = vld [vmem:[#allocation5 + $0x148] sm:$0xff]  ;;  %961 = vmatprep.subr.bf16.mxu0 %v360_v4  ;;  %v352_v14 = vunpack.c.h.s8.bf16 %v84_v10  ;;  %v115_v17 = vld [vmem:[#allocation5 + $0x140] sm:$0xff]  ;;  %v849_v19 = vunpack.c.l.s4 %v2005_v18  ;;  %v351_v21 = vunpack.c.h.s8.bf16 %v83_v16  ;;  %v348_v23 = vunpack.c.l.s8.bf16 %v84_v10  ;;  %s1969_s11 = scalar_lea.vmem %s1821_s3, 32  ;;  %p1974_p7 = scmp.lt.s32.totalorder %s1821_s3, %s1821_s3 }
  0x38   :  { %1002 = vmatprep.subr.bf16.mxu1 %v424_v6  ;;  %962 = vmatpush1.bf16.msra.mxu0 %v359_v8  ;;  %v416_v15 = vunpack.c.h.s8.bf16 %v116_v11  ;;  %v415_v22 = vunpack.c.h.s8.bf16 %v115_v17  ;;  %v412_v24 = vunpack.c.l.s8.bf16 %v116_v11  ;;  %v2044_v26 = vshrl.u32 %v851_v20, 7  ;;  %v80_v27 = vld [vmem:[#allocation5 + $0x28] sm:$0xff]  ;;  %v79_v33 = vld [vmem:[#allocation5 + $0x20] sm:$0xff]  ;;  %p1970_p6 = scmp.ne.s32.totalorder %s1821_s3, %s1969_s11  ;;  %p1975_p8 = scmp.lt.s32.totalorder %s1969_s11, %s1969_s11 }
  0x39   :  { %1003 = vmatpush1.bf16.msra.mxu1 %v423_v9  ;;  %963 = vmatprep.subr.bf16.mxu0 %v356_v3  ;;  %v850_v25 = vunpack.c.0.s8 %v849_v19  ;;  %v112_v28 = vld [vmem:[#allocation5 + $0x128] sm:$0xff]  ;;  %v347_v29 = vunpack.c.l.s8.bf16 %v83_v16  ;;  %v411_v30 = vunpack.c.l.s8.bf16 %v115_v17  ;;  %v344_v31 = vunpack.c.h.s8.bf16 %v80_v27  ;;  %v111_v34 = vld [vmem:[#allocation5 + $0x120] sm:$0xff] }
  0x3a   :  { %1004 = vmatprep.subr.bf16.mxu1 %v420_v5  ;;  %v408_v32 = vunpack.c.h.s8.bf16 %v112_v28  ;;  %v343_v37 = vunpack.c.h.s8.bf16 %v79_v33  ;;  %v407_v38 = vunpack.c.h.s8.bf16 %v111_v34  ;;  %v340_v39 = vunpack.c.l.s8.bf16 %v80_v27  ;;  %v76_v42 = vld [vmem:[#allocation5 + $0x8] sm:$0xff]  ;;  %v75_v49 = vld [vmem:[#allocation5] sm:$0xff]  ;;  %p1976_p9 = por %p1975_p8, %p1974_p7 }
  0x3b   :  { %v2047_v35 = vsub.s32 %v850_v25, %v2044_v26  ;;  %v404_v40 = vunpack.c.l.s8.bf16 %v112_v28  ;;  %v108_v43 = vld [vmem:[#allocation5 + $0x108] sm:$0xff]  ;;  %v339_v45 = vunpack.c.l.s8.bf16 %v79_v33  ;;  %v403_v46 = vunpack.c.l.s8.bf16 %v111_v34  ;;  %v107_v50 = vld [vmem:[#allocation5 + $0x100] sm:$0xff] }
  0x3c   :  { %964 = vmatpush1.bf16.msra.mxu0 %v355_v12  ;;  %v336_v47 = vunpack.c.h.s8.bf16 %v76_v42  ;;  %v400_v48 = vunpack.c.h.s8.bf16 %v108_v43  ;;  %v335_v53 = vunpack.c.h.s8.bf16 %v75_v49  ;;  %v399_v54 = vunpack.c.h.s8.bf16 %v107_v50  ;;  %v104_v57 = vld [vmem:[#allocation5 + $0xe8] sm:$0xff]  ;;  %v103_v63 = vld [vmem:[#allocation5 + $0xe0] sm:$0xff]  ;;  %p1977_p10 = pnand %p1976_p9, %p1970_p6 }
  0x3d   :  { %1005 = vmatpush1.bf16.msra.mxu1 %v419_v13  ;;  %965 = vmatprep.subr.bf16.mxu0 %v352_v14  ;;  %v2053_v41 = vrot.slane %v2049_v36, %v2047_v35  ;;  %v332_v55 = vunpack.c.l.s8.bf16 %v76_v42  ;;  %v396_v56 = vunpack.c.l.s8.bf16 %v108_v43  ;;  %v136_v58 = vld [vmem:[#allocation5 + $0x1e8] sm:$0xff]  ;;  %v331_v59 = vunpack.c.l.s8.bf16 %v75_v49  ;;  %v135_v0 = vld [vmem:[#allocation5 + $0x1e0] sm:$0xff] }
  0x3e   :  { %1006 = vmatprep.subr.bf16.mxu1 %v416_v15  ;;  %v395_v60 = vunpack.c.l.s8.bf16 %v107_v50  ;;  %v392_v61 = vunpack.c.h.s8.bf16 %v104_v57  ;;  %v456_v62 = vunpack.c.h.s8.bf16 %v136_v58  ;;  %v391_v1 = vunpack.c.h.s8.bf16 %v103_v63  ;;  %v100_v5 = vld [vmem:[#allocation5 + $0xc8] sm:$0xff]  ;;  %v99_v11 = vld [vmem:[#allocation5 + $0xc0] sm:$0xff] }
  0x3f   :  { %v862_v44 = vcombine.high %v2053_v41, %v2053_v41  ;;  %v455_v2 = vunpack.c.h.s8.bf16 %v135_v0  ;;  %v388_v3 = vunpack.c.l.s8.bf16 %v104_v57  ;;  %v452_v4 = vunpack.c.l.s8.bf16 %v136_v58  ;;  %v132_v6 = vld [vmem:[#allocation5 + $0x1c8] sm:$0xff]  ;;  %v131_v12 = vld [vmem:[#allocation5 + $0x1c0] sm:$0xff] }
  0x40   :  { %966 = vmatpush1.bf16.msra.mxu0 %v351_v21  ;;  %v387_v7 = vunpack.c.l.s8.bf16 %v103_v63  ;;  %v451_v8 = vunpack.c.l.s8.bf16 %v135_v0  ;;  %v384_v9 = vunpack.c.h.s8.bf16 %v100_v5  ;;  %v448_v10 = vunpack.c.h.s8.bf16 %v132_v6  ;;  %v96_v17 = vld [vmem:[#allocation5 + $0xa8] sm:$0xff]  ;;  %v183_v57 = vld [vmem:[#allocation5 + $0x360] sm:$0xff] }
  0x41   :  { %1007 = vmatpush1.bf16.msra.mxu1 %v415_v22  ;;  %967 = vmatprep.subr.bf16.mxu0 %v348_v23  ;;  %v2058_v51 = vrot.slane %v862_v44, %v2047_v35  ;;  %v383_v13 = vunpack.c.h.s8.bf16 %v99_v11  ;;  %v447_v14 = vunpack.c.h.s8.bf16 %v131_v12  ;;  %v380_v15 = vunpack.c.l.s8.bf16 %v100_v5  ;;  %v128_v18 = vld [vmem:[#allocation5 + $0x1a8] sm:$0xff]  ;;  %v95_v23 = vld [vmem:[#allocation5 + $0xa0] sm:$0xff] }
  0x42   :  { %1008 = vmatprep.subr.bf16.mxu1 %v412_v24  ;;  %v444_v16 = vunpack.c.l.s8.bf16 %v132_v6  ;;  %v379_v19 = vunpack.c.l.s8.bf16 %v99_v11  ;;  %v443_v20 = vunpack.c.l.s8.bf16 %v131_v12  ;;  %v376_v21 = vunpack.c.h.s8.bf16 %v96_v17  ;;  %v127_v24 = vld [vmem:[#allocation5 + $0x1a0] sm:$0xff]  ;;  %v148_v63 = vld [vmem:[#allocation5 + $0x248] sm:$0xff] }
  0x43   :  { %993 = vmatprep.mubr.bf16.mxu0 %v2058_v51  ;;  %v2063_v52 = vcombine.high %v2058_v51, %v2058_v51  ;;  %v440_v22 = vunpack.c.h.s8.bf16 %v128_v18  ;;  %v375_v25 = vunpack.c.h.s8.bf16 %v95_v23  ;;  %v439_v27 = vunpack.c.h.s8.bf16 %v127_v24  ;;  %v180_v0 = vld [vmem:[#allocation5 + $0x348] sm:$0xff]  ;;  %v147_v6 = vld [vmem:[#allocation5 + $0x240] sm:$0xff] }
  0x44   :  { %968 = vmatpush1.bf16.msra.mxu0 %v347_v29  ;;  %v372_v28 = vunpack.c.l.s8.bf16 %v96_v17  ;;  %v436_v29 = vunpack.c.l.s8.bf16 %v128_v18  ;;  %v371_v33 = vunpack.c.l.s8.bf16 %v95_v23  ;;  %v435_v34 = vunpack.c.l.s8.bf16 %v127_v24  ;;  %v144_v12 = vld [vmem:[#allocation5 + $0x228] sm:$0xff]  ;;  %v143_v18 = vld [vmem:[#allocation5 + $0x220] sm:$0xff] }
  0x45   :  { %1009 = vmatpush1.bf16.msra.mxu1 %v411_v30  ;;  %969 = vmatprep.subr.bf16.mxu0 %v344_v31  ;;  %v92_v30 = vld [vmem:[#allocation5 + $0x88] sm:$0xff]  ;;  %v2075_v49 = vrot.slane %v2053_v41, %v2047_v35  ;;  %v544_v5 = vunpack.c.h.s8.bf16 %v180_v0  ;;  %v540_v11 = vunpack.c.l.s8.bf16 %v180_v0 }
  0x46   :  { %1010 = vmatprep.subr.bf16.mxu1 %v408_v32  ;;  %1034 = vmatprep.mubr.bf16.mxu1 %v2063_v52  ;;  %v124_v31 = vld [vmem:[#allocation5 + $0x188] sm:$0xff]  ;;  %v847_v32 = vcombine.high %v2049_v36, %v2049_v36  ;;  %v364_v36 = vunpack.c.l.s8.bf16 %v92_v30 }
  0x47   :  { %v140_v24 = vld [vmem:[#allocation5 + $0x208] sm:$0xff] }
  0x48   :  { %970 = vmatpush1.bf16.msra.mxu0 %v343_v37  ;;  %v368_v37 = vunpack.c.h.s8.bf16 %v92_v30  ;;  %v2069_v42 = vrot.slane %v847_v32, %v2047_v35  ;;  %v171_v32 = vld [vmem:[#allocation5 + $0x300] sm:$0xff] }
  0x49   :  { %1011 = vmatpush1.bf16.msra.mxu1 %v407_v38  ;;  %971 = vmatprep.subr.bf16.mxu0 %v340_v39  ;;  %v432_v38 = vunpack.c.h.s8.bf16 %v124_v31  ;;  %v91_v39 = vld [vmem:[#allocation5 + $0x80] sm:$0xff] }
  0x4a   :  { %1012 = vmatprep.subr.bf16.mxu1 %v404_v40  ;;  %v123_v40 = vld [vmem:[#allocation5 + $0x180] sm:$0xff]  ;;  %v367_v43 = vunpack.c.h.s8.bf16 %v91_v39  ;;  %v363_v50 = vunpack.c.l.s8.bf16 %v91_v39  ;;  %v168_v39 = vld [vmem:[#allocation5 + $0x2e8] sm:$0xff] }
  0x4b   :  { %v431_v44 = vunpack.c.h.s8.bf16 %v123_v40 }
  0x4c   :  { %972 = vmatpush1.bf16.msra.mxu0 %v339_v45  ;;  %v428_v45 = vunpack.c.l.s8.bf16 %v124_v31  ;;  %v139_v31 = vld [vmem:[#allocation5 + $0x200] sm:$0xff] }
  0x4d   :  { %1013 = vmatpush1.bf16.msra.mxu1 %v403_v46  ;;  %973 = vmatprep.subr.bf16.mxu0 %v336_v47  ;;  %v152_v46 = vld [vmem:[#allocation5 + $0x268] sm:$0xff] }
  0x4e   :  { %1014 = vmatprep.subr.bf16.mxu1 %v400_v48  ;;  %v184_v47 = vld [vmem:[#allocation5 + $0x368] sm:$0xff]  ;;  %v863_v48 = vcombine.high %v2069_v42, %v2069_v42 }
  0x50   :  { %974 = vmatpush1.bf16.msra.mxu0 %v335_v53  ;;  %v427_v53 = vunpack.c.l.s8.bf16 %v123_v40  ;;  %v2078_v58 = vrot.slane %v863_v48, %v2047_v35  ;;  %v200_v40 = vld [vmem:[#allocation5 + $0x3e8] sm:$0xff] }
  0x51   :  { %1015 = vmatpush1.bf16.msra.mxu1 %v399_v54  ;;  %975 = vmatprep.subr.bf16.mxu0 %v332_v55  ;;  %v488_v54 = vunpack.c.h.s8.bf16 %v152_v46  ;;  %v552_v55 = vunpack.c.h.s8.bf16 %v184_v47 }
  0x52   :  { %1016 = vmatprep.subr.bf16.mxu1 %v396_v56  ;;  %v151_v56 = vld [vmem:[#allocation5 + $0x260] sm:$0xff] }
  0x53   :  { %v487_v41 = vunpack.c.h.s8.bf16 %v151_v56 }
  0x54   :  { %976 = vmatpush1.bf16.msra.mxu0 %v331_v59  ;;  %v2082_v59 = vcombine.high %v2075_v49, %v2075_v49 }
  0x55   :  { %1017 = vmatpush1.bf16.msra.mxu1 %v395_v60  ;;  %977 = vmatprep.subr.bf16.mxu0 %v392_v61  ;;  %v551_v60 = vunpack.c.h.s8.bf16 %v183_v57  ;;  %v484_v61 = vunpack.c.l.s8.bf16 %v152_v46  ;;  %v167_v46 = vld [vmem:[#allocation5 + $0x2e0] sm:$0xff] }
  0x56   :  { %1018 = vmatprep.subr.bf16.mxu1 %v456_v62  ;;  %v548_v62 = vunpack.c.l.s8.bf16 %v184_v47  ;;  %v199_v47 = vld [vmem:[#allocation5 + $0x3e0] sm:$0xff]  ;;  %v519_v48 = vunpack.c.h.s8.bf16 %v167_v46 }
  0x58   :  { %978 = vmatpush2.bf16.msra.mxu0 %v391_v1  ;;  %v2086_v1 = vcombine.high %v2078_v58, %v2078_v58 }
  0x59   :  { %1019 = vmatpush2.bf16.msra.mxu1 %v455_v2  ;;  %979 = vmatprep.subr.bf16.mxu0 %v388_v3  ;;  %v483_v2 = vunpack.c.l.s8.bf16 %v151_v56  ;;  %v547_v3 = vunpack.c.l.s8.bf16 %v183_v57  ;;  %v196_v56 = vld [vmem:[#allocation5 + $0x3c8] sm:$0xff]  ;;  %v515_v57 = vunpack.c.l.s8.bf16 %v167_v46 }
  0x5a   :  { %1020 = vmatprep.subr.bf16.mxu1 %v452_v4  ;;  %v480_v4 = vunpack.c.h.s8.bf16 %v148_v63 }
  0x5c   :  { %980 = vmatpush2.bf16.msra.mxu0 %v387_v7  ;;  %v179_v7 = vld [vmem:[#allocation5 + $0x340] sm:$0xff] }
  0x5d   :  { %1021 = vmatpush2.bf16.msra.mxu1 %v451_v8  ;;  %981 = vmatprep.subr.bf16.mxu0 %v384_v9  ;;  %v479_v8 = vunpack.c.h.s8.bf16 %v147_v6  ;;  %v543_v9 = vunpack.c.h.s8.bf16 %v179_v7 }
  0x5e   :  { %1022 = vmatprep.subr.bf16.mxu1 %v448_v10  ;;  %v476_v10 = vunpack.c.l.s8.bf16 %v148_v63  ;;  %v195_v63 = vld [vmem:[#allocation5 + $0x3c0] sm:$0xff] }
  0x60   :  { %982 = vmatpush2.bf16.msra.mxu0 %v383_v13  ;;  %v176_v13 = vld [vmem:[#allocation5 + $0x328] sm:$0xff] }
  0x61   :  { %1023 = vmatpush2.bf16.msra.mxu1 %v447_v14  ;;  %983 = vmatprep.subr.bf16.mxu0 %v380_v15  ;;  %v475_v14 = vunpack.c.l.s8.bf16 %v147_v6  ;;  %v539_v15 = vunpack.c.l.s8.bf16 %v179_v7  ;;  %v536_v17 = vunpack.c.h.s8.bf16 %v176_v13  ;;  %v532_v23 = vunpack.c.l.s8.bf16 %v176_v13  ;;  %v192_v6 = vld [vmem:[#allocation5 + $0x3a8] sm:$0xff] }
  0x62   :  { %1024 = vmatprep.subr.bf16.mxu1 %v444_v16  ;;  %v472_v16 = vunpack.c.h.s8.bf16 %v144_v12 }
  0x64   :  { %984 = vmatpush2.bf16.msra.mxu0 %v379_v19  ;;  %v175_v19 = vld [vmem:[#allocation5 + $0x320] sm:$0xff] }
  0x65   :  { %1025 = vmatpush2.bf16.msra.mxu1 %v443_v20  ;;  %985 = vmatprep.subr.bf16.mxu0 %v376_v21  ;;  %v471_v20 = vunpack.c.h.s8.bf16 %v143_v18  ;;  %v535_v21 = vunpack.c.h.s8.bf16 %v175_v19 }
  0x66   :  { %1026 = vmatprep.subr.bf16.mxu1 %v440_v22  ;;  %v468_v22 = vunpack.c.l.s8.bf16 %v144_v12  ;;  %v191_v12 = vld [vmem:[#allocation5 + $0x3a0] sm:$0xff] }
  0x68   :  { %986 = vmatpush2.bf16.msra.mxu0 %v375_v25  ;;  %v172_v25 = vld [vmem:[#allocation5 + $0x308] sm:$0xff] }
  0x69   :  { %1027 = vmatpush2.bf16.msra.mxu1 %v439_v27  ;;  %987 = vmatprep.subr.bf16.mxu0 %v372_v28  ;;  %v467_v27 = vunpack.c.l.s8.bf16 %v143_v18  ;;  %v531_v28 = vunpack.c.l.s8.bf16 %v175_v19  ;;  %v528_v30 = vunpack.c.h.s8.bf16 %v172_v25  ;;  %v188_v18 = vld [vmem:[#allocation5 + $0x388] sm:$0xff]  ;;  %v2092_v19 = vld [vmem:[#allocation2 + $0x8] sm:$0xff] }
  0x6a   :  { %1028 = vmatprep.subr.bf16.mxu1 %v436_v29  ;;  %v464_v29 = vunpack.c.h.s8.bf16 %v140_v24 }
  0x6c   :  { %988 = vmatpush2.bf16.msra.mxu0 %v371_v33  ;;  %v463_v33 = vunpack.c.h.s8.bf16 %v139_v31 }
  0x6d   :  { %1029 = vmatpush2.bf16.msra.mxu1 %v435_v34  ;;  %989 = vmatprep.subr.bf16.mxu0 %v368_v37  ;;  %v527_v34 = vunpack.c.h.s8.bf16 %v171_v32  ;;  %v460_v37 = vunpack.c.l.s8.bf16 %v140_v24  ;;  %v155_v24 = vld [vmem:[#allocation5 + $0x280] sm:$0xff] }
  0x6e   :  { %1030 = vmatprep.subr.bf16.mxu1 %v432_v38  ;;  %v524_v38 = vunpack.c.l.s8.bf16 %v172_v25  ;;  %v187_v25 = vld [vmem:[#allocation5 + $0x380] sm:$0xff] }
  0x70   :  { %990 = vmatpush2.bf16.msra.mxu0 %v367_v43  ;;  %v459_v43 = vunpack.c.l.s8.bf16 %v139_v31  ;;  %v556_v31 = vunpack.c.l.s8.bf16 %v188_v18 }
  0x71   :  { %1031 = vmatpush2.bf16.msra.mxu1 %v431_v44  ;;  %991 = vmatprep.subr.bf16.mxu0 %v364_v36  ;;  %v523_v44 = vunpack.c.l.s8.bf16 %v171_v32  ;;  %v520_v36 = vunpack.c.h.s8.bf16 %v168_v39  ;;  %v216_v32 = vld [vmem:[#allocation5 + $0x468] sm:$0xff] }
  0x72   :  { %1032 = vmatprep.subr.bf16.mxu1 %v428_v45  ;;  %v584_v45 = vunpack.c.h.s8.bf16 %v200_v40 }
  0x74   :  { %992 = vmatpush2.bf16.msra.mxu0 %v363_v50  ;;  %v583_v50 = vunpack.c.h.s8.bf16 %v199_v47 }
  0x75   :  { %1033 = vmatpush2.bf16.msra.mxu1 %v427_v53  ;;  %1043 = vmatprep.subr.bf16.mxu0 %v488_v54  ;;  %v516_v53 = vunpack.c.l.s8.bf16 %v168_v39  ;;  %v580_v54 = vunpack.c.l.s8.bf16 %v200_v40  ;;  %v555_v39 = vunpack.c.l.s8.bf16 %v187_v25  ;;  %v616_v40 = vunpack.c.h.s8.bf16 %v216_v32 }
  0x76   :  { %1084 = vmatprep.subr.bf16.mxu1 %v552_v55  ;;  %v164_v55 = vld [vmem:[#allocation5 + $0x2c8] sm:$0xff] }
  0x77   :  { %994 = vmatmul.mubr.bf16.vlgmr.msra.gmra.mxu0 %v2075_v49 }
  0x78   :  { %1035 = vmatmul.mubr.bf16.vlgmr.msra.gmra.mxu1 %v2082_v59  ;;  %1044 = vmatpush1.bf16.msra.mxu0 %v487_v41  ;;  %v579_v41 = vunpack.c.l.s8.bf16 %v199_v47 }
  0x79   :  { %1085 = vmatpush1.bf16.msra.mxu1 %v551_v60  ;;  %1045 = vmatprep.subr.bf16.mxu0 %v484_v61  ;;  %v512_v60 = vunpack.c.h.s8.bf16 %v164_v55  ;;  %v576_v61 = vunpack.c.h.s8.bf16 %v196_v56 }
  0x7a   :  { %1086 = vmatprep.subr.bf16.mxu1 %v548_v62  ;;  %1075 = vmatprep.mubr.bf16.mxu0 %v2078_v58  ;;  %v163_v62 = vld [vmem:[#allocation5 + $0x2c0] sm:$0xff] }
  0x7b   :  { %1116 = vmatprep.mubr.bf16.mxu1 %v2086_v1  ;;  %v511_v0 = vunpack.c.h.s8.bf16 %v163_v62  ;;  %v507_v7 = vunpack.c.l.s8.bf16 %v163_v62  ;;  %v243_v62 = vld [vmem:[#allocation5 + $0x540] sm:$0xff] }
  0x7c   :  { %1046 = vmatpush1.bf16.msra.mxu0 %v483_v2  ;;  %v575_v2 = vunpack.c.h.s8.bf16 %v195_v63 }
  0x7d   :  { %1087 = vmatpush1.bf16.msra.mxu1 %v547_v3  ;;  %1047 = vmatprep.subr.bf16.mxu0 %v480_v4  ;;  %v508_v3 = vunpack.c.l.s8.bf16 %v164_v55  ;;  %v572_v4 = vunpack.c.l.s8.bf16 %v196_v56 }
  0x7e   :  { %1088 = vmatprep.subr.bf16.mxu1 %v544_v5  ;;  %v160_v5 = vld [vmem:[#allocation5 + $0x2a8] sm:$0xff] }
  0x80   :  { %1048 = vmatpush1.bf16.msra.mxu0 %v479_v8  ;;  %v571_v8 = vunpack.c.l.s8.bf16 %v195_v63 }
  0x81   :  { %1089 = vmatpush1.bf16.msra.mxu1 %v543_v9  ;;  %1049 = vmatprep.subr.bf16.mxu0 %v476_v10  ;;  %v504_v9 = vunpack.c.h.s8.bf16 %v160_v5  ;;  %v568_v10 = vunpack.c.h.s8.bf16 %v192_v6 }
  0x82   :  { %1090 = vmatprep.subr.bf16.mxu1 %v540_v11  ;;  %v159_v11 = vld [vmem:[#allocation5 + $0x2a0] sm:$0xff] }
  0x83   :  { %v503_v13 = vunpack.c.h.s8.bf16 %v159_v11 }
  0x84   :  { %1050 = vmatpush1.bf16.msra.mxu0 %v475_v14  ;;  %v567_v14 = vunpack.c.h.s8.bf16 %v191_v12 }
  0x85   :  { %1091 = vmatpush1.bf16.msra.mxu1 %v539_v15  ;;  %1051 = vmatprep.subr.bf16.mxu0 %v472_v16  ;;  %v500_v15 = vunpack.c.l.s8.bf16 %v160_v5  ;;  %v564_v16 = vunpack.c.l.s8.bf16 %v192_v6  ;;  %v240_v5 = vld [vmem:[#allocation5 + $0x528] sm:$0xff] }
  0x86   :  { %1092 = vmatprep.subr.bf16.mxu1 %v536_v17  ;;  %v156_v17 = vld [vmem:[#allocation5 + $0x288] sm:$0xff] }
  0x88   :  { %1052 = vmatpush1.bf16.msra.mxu0 %v471_v20  ;;  %v499_v20 = vunpack.c.l.s8.bf16 %v159_v11  ;;  %v239_v11 = vld [vmem:[#allocation5 + $0x520] sm:$0xff] }
  0x89   :  { %1093 = vmatpush1.bf16.msra.mxu1 %v535_v21  ;;  %1053 = vmatprep.subr.bf16.mxu0 %v468_v22  ;;  %v563_v21 = vunpack.c.l.s8.bf16 %v191_v12  ;;  %v496_v22 = vunpack.c.h.s8.bf16 %v156_v17 }
  0x8a   :  { %1094 = vmatprep.subr.bf16.mxu1 %v532_v23  ;;  %v560_v23 = vunpack.c.h.s8.bf16 %v188_v18 }
  0x8c   :  { %1054 = vmatpush1.bf16.msra.mxu0 %v467_v27  ;;  %v2096_v27 = vrot.slane %v2092_v19, %v2047_v35 }
  0x8d   :  { %1095 = vmatpush1.bf16.msra.mxu1 %v531_v28  ;;  %1055 = vmatprep.subr.bf16.mxu0 %v464_v29  ;;  %v495_v28 = vunpack.c.h.s8.bf16 %v155_v24  ;;  %v559_v29 = vunpack.c.h.s8.bf16 %v187_v25 }
  0x8e   :  { %1096 = vmatprep.subr.bf16.mxu1 %v528_v30  ;;  %v492_v30 = vunpack.c.l.s8.bf16 %v156_v17  ;;  %v236_v17 = vld [vmem:[#allocation5 + $0x508] sm:$0xff] }
  0x90   :  { %1056 = vmatpush1.bf16.msra.mxu0 %v463_v33  ;;  %v248_v33 = vld [vmem:[#allocation5 + $0x568] sm:$0xff] }
  0x91   :  { %1097 = vmatpush1.bf16.msra.mxu1 %v527_v34  ;;  %1057 = vmatprep.subr.bf16.mxu0 %v460_v37  ;;  %v911_v34 = vcombine.high %v2096_v27, %v2096_v27  ;;  %v2102_v37 = vrot.slane %v2069_v42, %v2047_v35 }
  0x92   :  { %1098 = vmatprep.subr.bf16.mxu1 %v524_v38  ;;  %v491_v38 = vunpack.c.l.s8.bf16 %v155_v24  ;;  %v235_v24 = vld [vmem:[#allocation5 + $0x500] sm:$0xff] }
  0x93   :  { %v2109_v46 = vcombine.high %v2102_v37, %v2102_v37 }
  0x94   :  { %1058 = vmatpush1.bf16.msra.mxu0 %v459_v43  ;;  %v680_v43 = vunpack.c.h.s8.bf16 %v248_v33 }
  0x95   :  { %1099 = vmatpush1.bf16.msra.mxu1 %v523_v44  ;;  %1059 = vmatprep.subr.bf16.mxu0 %v520_v36  ;;  %v215_v44 = vld [vmem:[#allocation5 + $0x460] sm:$0xff] }
  0x96   :  { %1100 = vmatprep.subr.bf16.mxu1 %v584_v45  ;;  %v247_v36 = vld [vmem:[#allocation5 + $0x560] sm:$0xff]  ;;  %v2105_v45 = vrot.slane %v911_v34, %v2047_v35  ;;  %v615_v42 = vunpack.c.h.s8.bf16 %v215_v44  ;;  %v611_v56 = vunpack.c.l.s8.bf16 %v215_v44  ;;  %v651_v34 = vunpack.c.l.s8.bf16 %v235_v24 }
  0x97   :  { %v679_v47 = vunpack.c.h.s8.bf16 %v247_v36 }
  0x98   :  { %1060 = vmatpush2.bf16.msra.mxu0 %v519_v48  ;;  %v612_v48 = vunpack.c.l.s8.bf16 %v216_v32  ;;  %v2113_v55 = vcombine.high %v2105_v45, %v2105_v45  ;;  %v264_v32 = vld [vmem:[#allocation5 + $0x5e8] sm:$0xff] }
  0x99   :  { %1101 = vmatpush2.bf16.msra.mxu1 %v583_v50  ;;  %1061 = vmatprep.subr.bf16.mxu0 %v516_v53  ;;  %v676_v50 = vunpack.c.l.s8.bf16 %v248_v33  ;;  %v212_v53 = vld [vmem:[#allocation5 + $0x448] sm:$0xff] }
  0x9a   :  { %1102 = vmatprep.subr.bf16.mxu1 %v580_v54  ;;  %v244_v54 = vld [vmem:[#allocation5 + $0x548] sm:$0xff] }
  0x9c   :  { %1062 = vmatpush2.bf16.msra.mxu0 %v515_v57  ;;  %v675_v57 = vunpack.c.l.s8.bf16 %v247_v36 }
  0x9d   :  { %1103 = vmatpush2.bf16.msra.mxu1 %v579_v41  ;;  %1063 = vmatprep.subr.bf16.mxu0 %v512_v60  ;;  %v608_v41 = vunpack.c.h.s8.bf16 %v212_v53  ;;  %v672_v60 = vunpack.c.h.s8.bf16 %v244_v54 }
  0x9e   :  { %1104 = vmatprep.subr.bf16.mxu1 %v576_v61  ;;  %v211_v61 = vld [vmem:[#allocation5 + $0x440] sm:$0xff] }
  0x9f   :  { %v607_v63 = vunpack.c.h.s8.bf16 %v211_v61  ;;  %v603_v6 = vunpack.c.l.s8.bf16 %v211_v61 }
  0xa0   :  { %1064 = vmatpush2.bf16.msra.mxu0 %v511_v0  ;;  %v671_v0 = vunpack.c.h.s8.bf16 %v243_v62 }
  0xa1   :  { %1105 = vmatpush2.bf16.msra.mxu1 %v575_v2  ;;  %1065 = vmatprep.subr.bf16.mxu0 %v508_v3  ;;  %v604_v2 = vunpack.c.l.s8.bf16 %v212_v53  ;;  %v668_v3 = vunpack.c.l.s8.bf16 %v244_v54 }
  0xa2   :  { %1106 = vmatprep.subr.bf16.mxu1 %v572_v4  ;;  %v208_v4 = vld [vmem:[#allocation5 + $0x428] sm:$0xff] }
  0xa4   :  { %1066 = vmatpush2.bf16.msra.mxu0 %v507_v7  ;;  %v667_v7 = vunpack.c.l.s8.bf16 %v243_v62 }
  0xa5   :  { %1107 = vmatpush2.bf16.msra.mxu1 %v571_v8  ;;  %1067 = vmatprep.subr.bf16.mxu0 %v504_v9  ;;  %v600_v8 = vunpack.c.h.s8.bf16 %v208_v4  ;;  %v664_v9 = vunpack.c.h.s8.bf16 %v240_v5 }
  0xa6   :  { %1108 = vmatprep.subr.bf16.mxu1 %v568_v10  ;;  %v207_v10 = vld [vmem:[#allocation5 + $0x420] sm:$0xff] }
  0xa7   :  { %v599_v12 = vunpack.c.h.s8.bf16 %v207_v10  ;;  %v595_v18 = vunpack.c.l.s8.bf16 %v207_v10 }
  0xa8   :  { %1068 = vmatpush2.bf16.msra.mxu0 %v503_v13  ;;  %v663_v13 = vunpack.c.h.s8.bf16 %v239_v11 }
  0xa9   :  { %1109 = vmatpush2.bf16.msra.mxu1 %v567_v14  ;;  %1069 = vmatprep.subr.bf16.mxu0 %v500_v15  ;;  %v596_v14 = vunpack.c.l.s8.bf16 %v208_v4  ;;  %v660_v15 = vunpack.c.l.s8.bf16 %v240_v5 }
  0xaa   :  { %1110 = vmatprep.subr.bf16.mxu1 %v564_v16  ;;  %v204_v16 = vld [vmem:[#allocation5 + $0x408] sm:$0xff] }
  0xac   :  { %1070 = vmatpush2.bf16.msra.mxu0 %v499_v20  ;;  %v659_v20 = vunpack.c.l.s8.bf16 %v239_v11 }
  0xad   :  { %1111 = vmatpush2.bf16.msra.mxu1 %v563_v21  ;;  %1071 = vmatprep.subr.bf16.mxu0 %v496_v22  ;;  %v592_v21 = vunpack.c.h.s8.bf16 %v204_v16  ;;  %v656_v22 = vunpack.c.h.s8.bf16 %v236_v17 }
  0xae   :  { %1112 = vmatprep.subr.bf16.mxu1 %v560_v23  ;;  %v203_v23 = vld [vmem:[#allocation5 + $0x400] sm:$0xff] }
  0xaf   :  { %v591_v25 = vunpack.c.h.s8.bf16 %v203_v23  ;;  %v587_v33 = vunpack.c.l.s8.bf16 %v203_v23  ;;  %v251_v23 = vld [vmem:[#allocation5 + $0x580] sm:$0xff] }
  0xb0   :  { %1072 = vmatpush2.bf16.msra.mxu0 %v495_v28  ;;  %v655_v28 = vunpack.c.h.s8.bf16 %v235_v24 }
  0xb1   :  { %1113 = vmatpush2.bf16.msra.mxu1 %v559_v29  ;;  %1073 = vmatprep.subr.bf16.mxu0 %v492_v30  ;;  %v588_v29 = vunpack.c.l.s8.bf16 %v204_v16  ;;  %v652_v30 = vunpack.c.l.s8.bf16 %v236_v17  ;;  %v896_v16 = vcombine.high %v2092_v19, %v2092_v19 }
  0xb2   :  { %1114 = vmatprep.subr.bf16.mxu1 %v556_v31  ;;  %v232_v31 = vld [vmem:[#allocation5 + $0x4e8] sm:$0xff] }
  0xb3   :  { %v2122_v24 = vrot.slane %v896_v16, %v2047_v35 }
  0xb4   :  { %1074 = vmatpush2.bf16.msra.mxu0 %v491_v38  ;;  %v648_v38 = vunpack.c.h.s8.bf16 %v232_v31 }
  0xb5   :  { %1115 = vmatpush2.bf16.msra.mxu1 %v555_v39  ;;  %1125 = vmatprep.subr.bf16.mxu0 %v616_v40  ;;  %v712_v39 = vunpack.c.h.s8.bf16 %v264_v32  ;;  %v231_v40 = vld [vmem:[#allocation5 + $0x4e0] sm:$0xff] }
  0xb6   :  { %1166 = vmatprep.subr.bf16.mxu1 %v680_v43  ;;  %v263_v43 = vld [vmem:[#allocation5 + $0x5e0] sm:$0xff]  ;;  %v647_v44 = vunpack.c.h.s8.bf16 %v231_v40  ;;  %v643_v53 = vunpack.c.l.s8.bf16 %v231_v40 }
  0xb7   :  { %1076 = vmatmul.mubr.bf16.vlgmr.msra.gmra.mxu0 %v2102_v37  ;;  %v711_v36 = vunpack.c.h.s8.bf16 %v263_v43  ;;  %v707_v54 = vunpack.c.l.s8.bf16 %v263_v43  ;;  %v279_v43 = vld [vmem:[#allocation5 + $0x660] sm:$0xff] }
  0xb8   :  { %1117 = vmatmul.mubr.bf16.vlgmr.msra.gmra.mxu1 %v2109_v46  ;;  %1126 = vmatpush1.bf16.msra.mxu0 %v615_v42  ;;  %v644_v42 = vunpack.c.l.s8.bf16 %v232_v31  ;;  %v312_v31 = vld [vmem:[#allocation5 + $0x768] sm:$0xff] }
  0xb9   :  { %1167 = vmatpush1.bf16.msra.mxu1 %v679_v47  ;;  %1127 = vmatprep.subr.bf16.mxu0 %v612_v48  ;;  %v708_v47 = vunpack.c.l.s8.bf16 %v264_v32  ;;  %v228_v48 = vld [vmem:[#allocation5 + $0x4c8] sm:$0xff]  ;;  %v912_v32 = vcombine.high %v2122_v24, %v2122_v24  ;;  %v808_v40 = vunpack.c.h.s8.bf16 %v312_v31 }
  0xba   :  { %1168 = vmatprep.subr.bf16.mxu1 %v676_v50  ;;  %1157 = vmatprep.mubr.bf16.mxu0 %v2105_v45  ;;  %v260_v50 = vld [vmem:[#allocation5 + $0x5c8] sm:$0xff] }
  0xbb   :  { %1198 = vmatprep.mubr.bf16.mxu1 %v2113_v55 }
  0xbc   :  { %1128 = vmatpush1.bf16.msra.mxu0 %v611_v56  ;;  %v640_v56 = vunpack.c.h.s8.bf16 %v228_v48 }
  0xbd   :  { %1169 = vmatpush1.bf16.msra.mxu1 %v675_v57  ;;  %1129 = vmatprep.subr.bf16.mxu0 %v608_v41  ;;  %v704_v57 = vunpack.c.h.s8.bf16 %v260_v50  ;;  %v227_v41 = vld [vmem:[#allocation5 + $0x4c0] sm:$0xff] }
  0xbe   :  { %1170 = vmatprep.subr.bf16.mxu1 %v672_v60  ;;  %v259_v60 = vld [vmem:[#allocation5 + $0x5c0] sm:$0xff]  ;;  %v639_v61 = vunpack.c.h.s8.bf16 %v227_v41  ;;  %v635_v4 = vunpack.c.l.s8.bf16 %v227_v41 }
  0xbf   :  { %v703_v62 = vunpack.c.h.s8.bf16 %v259_v60  ;;  %v699_v5 = vunpack.c.l.s8.bf16 %v259_v60 }
  0xc0   :  { %1130 = vmatpush1.bf16.msra.mxu0 %v607_v63  ;;  %v636_v63 = vunpack.c.l.s8.bf16 %v228_v48 }
  0xc1   :  { %1171 = vmatpush1.bf16.msra.mxu1 %v671_v0  ;;  %1131 = vmatprep.subr.bf16.mxu0 %v604_v2  ;;  %v700_v0 = vunpack.c.l.s8.bf16 %v260_v50  ;;  %v224_v2 = vld [vmem:[#allocation5 + $0x4a8] sm:$0xff]  ;;  %v804_v50 = vunpack.c.l.s8.bf16 %v312_v31 }
  0xc2   :  { %1172 = vmatprep.subr.bf16.mxu1 %v668_v3  ;;  %v256_v3 = vld [vmem:[#allocation5 + $0x5a8] sm:$0xff] }
  0xc4   :  { %1132 = vmatpush1.bf16.msra.mxu0 %v603_v6  ;;  %v632_v6 = vunpack.c.h.s8.bf16 %v224_v2 }
  0xc5   :  { %1173 = vmatpush1.bf16.msra.mxu1 %v667_v7  ;;  %1133 = vmatprep.subr.bf16.mxu0 %v600_v8  ;;  %v696_v7 = vunpack.c.h.s8.bf16 %v256_v3  ;;  %v223_v8 = vld [vmem:[#allocation5 + $0x4a0] sm:$0xff] }
  0xc6   :  { %1174 = vmatprep.subr.bf16.mxu1 %v664_v9  ;;  %v255_v9 = vld [vmem:[#allocation5 + $0x5a0] sm:$0xff]  ;;  %v631_v10 = vunpack.c.h.s8.bf16 %v223_v8  ;;  %v627_v17 = vunpack.c.l.s8.bf16 %v223_v8 }
  0xc7   :  { %v695_v11 = vunpack.c.h.s8.bf16 %v255_v9 }
  0xc8   :  { %1134 = vmatpush1.bf16.msra.mxu0 %v599_v12  ;;  %v628_v12 = vunpack.c.l.s8.bf16 %v224_v2 }
  0xc9   :  { %1175 = vmatpush1.bf16.msra.mxu1 %v663_v13  ;;  %1135 = vmatprep.subr.bf16.mxu0 %v596_v14  ;;  %v692_v13 = vunpack.c.l.s8.bf16 %v256_v3  ;;  %v220_v14 = vld [vmem:[#allocation5 + $0x488] sm:$0xff] }
  0xca   :  { %1176 = vmatprep.subr.bf16.mxu1 %v660_v15  ;;  %v252_v15 = vld [vmem:[#allocation5 + $0x588] sm:$0xff]  ;;  %v620_v19 = vunpack.c.l.s8.bf16 %v220_v14 }
  0xcc   :  { %1136 = vmatpush1.bf16.msra.mxu0 %v595_v18  ;;  %v691_v18 = vunpack.c.l.s8.bf16 %v255_v9 }
  0xcd   :  { %1177 = vmatpush1.bf16.msra.mxu1 %v659_v20  ;;  %1137 = vmatprep.subr.bf16.mxu0 %v592_v21  ;;  %v624_v20 = vunpack.c.h.s8.bf16 %v220_v14  ;;  %v688_v21 = vunpack.c.h.s8.bf16 %v252_v15 }
  0xce   :  { %1178 = vmatprep.subr.bf16.mxu1 %v656_v22  ;;  %v219_v22 = vld [vmem:[#allocation5 + $0x480] sm:$0xff] }
  0xd0   :  { %1138 = vmatpush1.bf16.msra.mxu0 %v591_v25  ;;  %v623_v25 = vunpack.c.h.s8.bf16 %v219_v22 }
  0xd1   :  { %1179 = vmatpush1.bf16.msra.mxu1 %v655_v28  ;;  %1139 = vmatprep.subr.bf16.mxu0 %v588_v29  ;;  %v687_v28 = vunpack.c.h.s8.bf16 %v251_v23  ;;  %v684_v29 = vunpack.c.l.s8.bf16 %v252_v15 }
  0xd2   :  { %1180 = vmatprep.subr.bf16.mxu1 %v652_v30  ;;  %v280_v30 = vld [vmem:[#allocation5 + $0x668] sm:$0xff] }
  0xd3   :  { %v740_v48 = vunpack.c.l.s8.bf16 %v280_v30 }
  0xd4   :  { %1140 = vmatpush1.bf16.msra.mxu0 %v587_v33  ;;  %v2128_v33 = vrot.slane %v2096_v27, %v2047_v35  ;;  %v743_v27 = vunpack.c.h.s8.bf16 %v279_v43 }
  0xd5   :  { %1181 = vmatpush1.bf16.msra.mxu1 %v651_v34  ;;  %1141 = vmatprep.subr.bf16.mxu0 %v648_v38  ;;  %v619_v34 = vunpack.c.l.s8.bf16 %v219_v22  ;;  %v683_v38 = vunpack.c.l.s8.bf16 %v251_v23 }
  0xd6   :  { %1182 = vmatprep.subr.bf16.mxu1 %v712_v39  ;;  %v744_v39 = vunpack.c.h.s8.bf16 %v280_v30 }
  0xd8   :  { %1142 = vmatpush2.bf16.msra.mxu0 %v647_v44  ;;  %v311_v44 = vld [vmem:[#allocation5 + $0x760] sm:$0xff] }
  0xd9   :  { %1183 = vmatpush2.bf16.msra.mxu1 %v711_v36  ;;  %1143 = vmatprep.subr.bf16.mxu0 %v644_v42  ;;  %v2131_v36 = vrot.slane %v912_v32, %v2047_v35  ;;  %v2135_v42 = vcombine.high %v2128_v33, %v2128_v33  ;;  %v803_v41 = vunpack.c.l.s8.bf16 %v311_v44  ;;  %v296_v32 = vld [vmem:[#allocation5 + $0x6e8] sm:$0xff] }
  0xda   :  { %1184 = vmatprep.subr.bf16.mxu1 %v708_v47  ;;  %v807_v47 = vunpack.c.h.s8.bf16 %v311_v44  ;;  %v295_v44 = vld [vmem:[#allocation5 + $0x6e0] sm:$0xff] }
  0xdc   :  { %1144 = vmatpush2.bf16.msra.mxu0 %v643_v53  ;;  %v276_v53 = vld [vmem:[#allocation5 + $0x648] sm:$0xff] }
  0xdd   :  { %1185 = vmatpush2.bf16.msra.mxu1 %v707_v54  ;;  %1145 = vmatprep.subr.bf16.mxu0 %v640_v56  ;;  %v308_v54 = vld [vmem:[#allocation5 + $0x748] sm:$0xff]  ;;  %v2139_v56 = vcombine.high %v2131_v36, %v2131_v36  ;;  %v736_v60 = vunpack.c.h.s8.bf16 %v276_v53  ;;  %v732_v3 = vunpack.c.l.s8.bf16 %v276_v53 }
  0xde   :  { %1186 = vmatprep.subr.bf16.mxu1 %v704_v57  ;;  %v739_v57 = vunpack.c.l.s8.bf16 %v279_v43 }
  0xe0   :  { %1146 = vmatpush2.bf16.msra.mxu0 %v639_v61  ;;  %v800_v61 = vunpack.c.h.s8.bf16 %v308_v54 }
  0xe1   :  { %1187 = vmatpush2.bf16.msra.mxu1 %v703_v62  ;;  %1147 = vmatprep.subr.bf16.mxu0 %v636_v63  ;;  %v275_v62 = vld [vmem:[#allocation5 + $0x640] sm:$0xff] }
  0xe2   :  { %1188 = vmatprep.subr.bf16.mxu1 %v700_v0  ;;  %v307_v63 = vld [vmem:[#allocation5 + $0x740] sm:$0xff]  ;;  %v735_v0 = vunpack.c.h.s8.bf16 %v275_v62 }
  0xe3   :  { %v799_v2 = vunpack.c.h.s8.bf16 %v307_v63  ;;  %v795_v8 = vunpack.c.l.s8.bf16 %v307_v63  ;;  %v291_v63 = vld [vmem:[#allocation5 + $0x6c0] sm:$0xff] }
  0xe4   :  { %1148 = vmatpush2.bf16.msra.mxu0 %v635_v4  ;;  %v796_v4 = vunpack.c.l.s8.bf16 %v308_v54  ;;  %v292_v54 = vld [vmem:[#allocation5 + $0x6c8] sm:$0xff] }
  0xe5   :  { %1189 = vmatpush2.bf16.msra.mxu1 %v699_v5  ;;  %1149 = vmatprep.subr.bf16.mxu0 %v632_v6  ;;  %v272_v5 = vld [vmem:[#allocation5 + $0x628] sm:$0xff] }
  0xe6   :  { %1190 = vmatprep.subr.bf16.mxu1 %v696_v7  ;;  %v304_v6 = vld [vmem:[#allocation5 + $0x728] sm:$0xff]  ;;  %v731_v7 = vunpack.c.l.s8.bf16 %v275_v62  ;;  %v728_v9 = vunpack.c.h.s8.bf16 %v272_v5  ;;  %v724_v15 = vunpack.c.l.s8.bf16 %v272_v5 }
  0xe7   :  { %v788_v16 = vunpack.c.l.s8.bf16 %v304_v6 }
  0xe8   :  { %1150 = vmatpush2.bf16.msra.mxu0 %v631_v10  ;;  %v792_v10 = vunpack.c.h.s8.bf16 %v304_v6  ;;  %v288_v6 = vld [vmem:[#allocation5 + $0x6a8] sm:$0xff] }
  0xe9   :  { %1191 = vmatpush2.bf16.msra.mxu1 %v695_v11  ;;  %1151 = vmatprep.subr.bf16.mxu0 %v628_v12  ;;  %v271_v11 = vld [vmem:[#allocation5 + $0x620] sm:$0xff] }
  0xea   :  { %1192 = vmatprep.subr.bf16.mxu1 %v692_v13  ;;  %v303_v12 = vld [vmem:[#allocation5 + $0x720] sm:$0xff]  ;;  %v727_v13 = vunpack.c.h.s8.bf16 %v271_v11 }
  0xeb   :  { %v791_v14 = vunpack.c.h.s8.bf16 %v303_v12 }
  0xec   :  { %1152 = vmatpush2.bf16.msra.mxu0 %v627_v17  ;;  %v268_v17 = vld [vmem:[#allocation5 + $0x608] sm:$0xff] }
  0xed   :  { %1193 = vmatpush2.bf16.msra.mxu1 %v691_v18  ;;  %1153 = vmatprep.subr.bf16.mxu0 %v624_v20  ;;  %v300_v18 = vld [vmem:[#allocation5 + $0x708] sm:$0xff]  ;;  %v723_v20 = vunpack.c.l.s8.bf16 %v271_v11  ;;  %v720_v22 = vunpack.c.h.s8.bf16 %v268_v17  ;;  %v716_v30 = vunpack.c.l.s8.bf16 %v268_v17 }
  0xee   :  { %1194 = vmatprep.subr.bf16.mxu1 %v688_v21  ;;  %v787_v21 = vunpack.c.l.s8.bf16 %v303_v12  ;;  %v784_v23 = vunpack.c.h.s8.bf16 %v300_v18  ;;  %v780_v31 = vunpack.c.l.s8.bf16 %v300_v18  ;;  %v287_v12 = vld [vmem:[#allocation5 + $0x6a0] sm:$0xff]  ;;  %v284_v18 = vld [vmem:[#allocation5 + $0x688] sm:$0xff] }
  0xf0   :  { %1154 = vmatpush2.bf16.msra.mxu0 %v623_v25  ;;  %v267_v25 = vld [vmem:[#allocation5 + $0x600] sm:$0xff] }
  0xf1   :  { %1195 = vmatpush2.bf16.msra.mxu1 %v687_v28  ;;  %1155 = vmatprep.subr.bf16.mxu0 %v620_v19  ;;  %v299_v28 = vld [vmem:[#allocation5 + $0x700] sm:$0xff]  ;;  %v719_v19 = vunpack.c.h.s8.bf16 %v267_v25 }
  0xf2   :  { %1196 = vmatprep.subr.bf16.mxu1 %v684_v29  ;;  %v783_v29 = vunpack.c.h.s8.bf16 %v299_v28 }
  0xf4   :  { %1156 = vmatpush2.bf16.msra.mxu0 %v619_v34  ;;  %v328_v34 = vld [vmem:[#allocation5 + $0x7e8] sm:$0xff] }
  0xf5   :  { %1197 = vmatpush2.bf16.msra.mxu1 %v683_v38  ;;  %1207 = vmatprep.subr.bf16.mxu0 %v744_v39  ;;  %v715_v38 = vunpack.c.l.s8.bf16 %v267_v25  ;;  %v779_v39 = vunpack.c.l.s8.bf16 %v299_v28  ;;  %v840_v43 = vunpack.c.h.s8.bf16 %v328_v34  ;;  %v836_v53 = vunpack.c.l.s8.bf16 %v328_v34  ;;  %v283_v28 = vld [vmem:[#allocation5 + $0x680] sm:$0xff]  ;;  %v90_v34 = vld [vmem:[#allocation5 + $0x78] sm:$0xff] }
  0xf6   :  { %1248 = vmatprep.subr.bf16.mxu1 %v808_v40  ;;  %v776_v40 = vunpack.c.h.s8.bf16 %v296_v32 }
  0xf7   :  { %1158 = vmatmul.mubr.bf16.vlgmr.msra.gmra.mxu0 %v2128_v33 }
  0xf8   :  { %1199 = vmatmul.mubr.bf16.vlgmr.msra.gmra.mxu1 %v2135_v42  ;;  %1208 = vmatpush1.bf16.msra.mxu0 %v743_v27  ;;  %v327_v27 = vld [vmem:[#allocation5 + $0x7e0] sm:$0xff] }
  0xf9   :  { %1249 = vmatpush1.bf16.msra.mxu1 %v807_v47  ;;  %1209 = vmatprep.subr.bf16.mxu0 %v740_v48  ;;  %v775_v47 = vunpack.c.h.s8.bf16 %v295_v44  ;;  %v839_v48 = vunpack.c.h.s8.bf16 %v327_v27 }
  0xfa   :  { %1250 = vmatprep.subr.bf16.mxu1 %v804_v50  ;;  %1239 = vmatprep.mubr.bf16.mxu0 %v2131_v36  ;;  %v772_v50 = vunpack.c.l.s8.bf16 %v296_v32 }
  0xfb   :  { %1280 = vmatprep.mubr.bf16.mxu1 %v2139_v56 }
  0xfc   :  { %1210 = vmatpush1.bf16.msra.mxu0 %v739_v57  ;;  %v324_v57 = vld [vmem:[#allocation5 + $0x7c8] sm:$0xff] }
  0xfd   :  { %1251 = vmatpush1.bf16.msra.mxu1 %v803_v41  ;;  %1211 = vmatprep.subr.bf16.mxu0 %v736_v60  ;;  %v771_v41 = vunpack.c.l.s8.bf16 %v295_v44  ;;  %v835_v60 = vunpack.c.l.s8.bf16 %v327_v27  ;;  %v832_v62 = vunpack.c.h.s8.bf16 %v324_v57  ;;  %v828_v5 = vunpack.c.l.s8.bf16 %v324_v57  ;;  %v86_v57 = vld [vmem:[#allocation5 + $0x58] sm:$0xff] }
  0xfe   :  { %1252 = vmatprep.subr.bf16.mxu1 %v800_v61  ;;  %v768_v61 = vunpack.c.h.s8.bf16 %v292_v54  ;;  %v362_v44 = vunpack.c.h.s8.bf16 %v90_v34 }
 0x100   :  { %1212 = vmatpush1.bf16.msra.mxu0 %v735_v0  ;;  %v323_v0 = vld [vmem:[#allocation5 + $0x7c0] sm:$0xff] }
 0x101   :  { %1253 = vmatpush1.bf16.msra.mxu1 %v799_v2  ;;  %1213 = vmatprep.subr.bf16.mxu0 %v732_v3  ;;  %v767_v2 = vunpack.c.h.s8.bf16 %v291_v63  ;;  %v831_v3 = vunpack.c.h.s8.bf16 %v323_v0 }
 0x102   :  { %1254 = vmatprep.subr.bf16.mxu1 %v796_v4  ;;  %v764_v4 = vunpack.c.l.s8.bf16 %v292_v54 }
 0x104   :  { %1214 = vmatpush1.bf16.msra.mxu0 %v731_v7  ;;  %v320_v7 = vld [vmem:[#allocation5 + $0x7a8] sm:$0xff] }
 0x105   :  { %1255 = vmatpush1.bf16.msra.mxu1 %v795_v8  ;;  %1215 = vmatprep.subr.bf16.mxu0 %v728_v9  ;;  %v763_v8 = vunpack.c.l.s8.bf16 %v291_v63  ;;  %v827_v9 = vunpack.c.l.s8.bf16 %v323_v0  ;;  %v824_v11 = vunpack.c.h.s8.bf16 %v320_v7  ;;  %v820_v17 = vunpack.c.l.s8.bf16 %v320_v7  ;;  %v117_v7 = vld [vmem:[#allocation5 + $0x150] sm:$0xff] }
 0x106   :  { %1256 = vmatprep.subr.bf16.mxu1 %v792_v10  ;;  %v760_v10 = vunpack.c.h.s8.bf16 %v288_v6 }
 0x108   :  { %1216 = vmatpush1.bf16.msra.mxu0 %v727_v13  ;;  %v319_v13 = vld [vmem:[#allocation5 + $0x7a0] sm:$0xff] }
 0x109   :  { %1257 = vmatpush1.bf16.msra.mxu1 %v791_v14  ;;  %1217 = vmatprep.subr.bf16.mxu0 %v724_v15  ;;  %v759_v14 = vunpack.c.h.s8.bf16 %v287_v12  ;;  %v823_v15 = vunpack.c.h.s8.bf16 %v319_v13 }
 0x10a   :  { %1258 = vmatprep.subr.bf16.mxu1 %v788_v16  ;;  %v756_v16 = vunpack.c.l.s8.bf16 %v288_v6  ;;  %v85_v6 = vld [vmem:[#allocation5 + $0x50] sm:$0xff] }
 0x10c   :  { %1218 = vmatpush1.bf16.msra.mxu0 %v723_v20  ;;  %v316_v20 = vld [vmem:[#allocation5 + $0x788] sm:$0xff] }
 0x10d   :  { %1259 = vmatpush1.bf16.msra.mxu1 %v787_v21  ;;  %1219 = vmatprep.subr.bf16.mxu0 %v720_v22  ;;  %v755_v21 = vunpack.c.l.s8.bf16 %v287_v12  ;;  %v819_v22 = vunpack.c.l.s8.bf16 %v319_v13  ;;  %v816_v25 = vunpack.c.h.s8.bf16 %v316_v20  ;;  %v812_v32 = vunpack.c.l.s8.bf16 %v316_v20 }
 0x10e   :  { %1260 = vmatprep.subr.bf16.mxu1 %v784_v23  ;;  %v752_v23 = vunpack.c.h.s8.bf16 %v284_v18  ;;  %v417_v12 = vunpack.c.h.s8.bf16 %v117_v7  ;;  %v349_v20 = vunpack.c.l.s8.bf16 %v85_v6 }
 0x110   :  { %1220 = vmatpush1.bf16.msra.mxu0 %v719_v19  ;;  %v315_v19 = vld [vmem:[#allocation5 + $0x780] sm:$0xff] }
 0x111   :  { %1261 = vmatpush1.bf16.msra.mxu1 %v783_v29  ;;  %1221 = vmatprep.subr.bf16.mxu0 %v716_v30  ;;  %v751_v29 = vunpack.c.h.s8.bf16 %v283_v28  ;;  %v815_v30 = vunpack.c.h.s8.bf16 %v315_v19 }
 0x112   :  { %1262 = vmatprep.subr.bf16.mxu1 %v780_v31  ;;  %v748_v31 = vunpack.c.l.s8.bf16 %v284_v18  ;;  %v114_v18 = vld [vmem:[#allocation5 + $0x138] sm:$0xff] }
 0x114   :  { %1222 = vmatpush1.bf16.msra.mxu0 %v715_v38  ;;  %v122_v38 = vld [vmem:[#allocation5 + $0x178] sm:$0xff] }
 0x115   :  { %1263 = vmatpush1.bf16.msra.mxu1 %v779_v39  ;;  %1223 = vmatprep.subr.bf16.mxu0 %v776_v40  ;;  %v2147_v39 = vrot.slane %v2122_v24, %v2047_v35  ;;  %v747_v40 = vunpack.c.l.s8.bf16 %v283_v28  ;;  %v426_v27 = vunpack.c.h.s8.bf16 %v122_v38  ;;  %v358_v35 = vunpack.c.l.s8.bf16 %v90_v34 }
 0x116   :  { %1264 = vmatprep.subr.bf16.mxu1 %v840_v43  ;;  %v811_v43 = vunpack.c.l.s8.bf16 %v315_v19  ;;  %v422_v24 = vunpack.c.l.s8.bf16 %v122_v38 }
 0x118   :  { %1224 = vmatpush2.bf16.msra.mxu0 %v775_v47  ;;  %v89_v47 = vld [vmem:[#allocation5 + $0x70] sm:$0xff] }
 0x119   :  { %1265 = vmatpush2.bf16.msra.mxu1 %v839_v48  ;;  %1225 = vmatprep.subr.bf16.mxu0 %v772_v50  ;;  %v121_v48 = vld [vmem:[#allocation5 + $0x170] sm:$0xff]  ;;  %v2151_v50 = vcombine.high %v2147_v39, %v2147_v39  ;;  %v357_v63 = vunpack.c.l.s8.bf16 %v89_v47 }
 0x11a   :  { %1266 = vmatprep.subr.bf16.mxu1 %v836_v53  ;;  %v361_v53 = vunpack.c.h.s8.bf16 %v89_v47  ;;  %v425_v54 = vunpack.c.h.s8.bf16 %v121_v48  ;;  %v421_v0 = vunpack.c.l.s8.bf16 %v121_v48 }
 0x11c   :  { %1226 = vmatpush2.bf16.msra.mxu0 %v771_v41  ;;  %v118_v41 = vld [vmem:[#allocation5 + $0x158] sm:$0xff] }
 0x11d   :  { %1267 = vmatpush2.bf16.msra.mxu1 %v835_v60  ;;  %1227 = vmatprep.subr.bf16.mxu0 %v768_v61 }
 0x11e   :  { %1268 = vmatprep.subr.bf16.mxu1 %v832_v62 }
 0x120   :  { %1228 = vmatpush2.bf16.msra.mxu0 %v767_v2 }
 0x121   :  { %1269 = vmatpush2.bf16.msra.mxu1 %v831_v3  ;;  %1229 = vmatprep.subr.bf16.mxu0 %v764_v4  ;;  %v354_v4 = vunpack.c.h.s8.bf16 %v86_v57 }
 0x122   :  { %1270 = vmatprep.subr.bf16.mxu1 %v828_v5  ;;  %v418_v5 = vunpack.c.h.s8.bf16 %v118_v41 }
 0x124   :  { %1230 = vmatpush2.bf16.msra.mxu0 %v763_v8 }
 0x125   :  { %1271 = vmatpush2.bf16.msra.mxu1 %v827_v9  ;;  %1231 = vmatprep.subr.bf16.mxu0 %v760_v10 }
 0x126   :  { %1272 = vmatprep.subr.bf16.mxu1 %v824_v11  ;;  %v353_v11 = vunpack.c.h.s8.bf16 %v85_v6  ;;  %v134_v6 = vld [vmem:[#allocation5 + $0x1d8] sm:$0xff] }
 0x128   :  { %1232 = vmatpush2.bf16.msra.mxu0 %v759_v14 }
 0x129   :  { %1273 = vmatpush2.bf16.msra.mxu1 %v823_v15  ;;  %1233 = vmatprep.subr.bf16.mxu0 %v756_v16  ;;  %v350_v15 = vunpack.c.l.s8.bf16 %v86_v57  ;;  %v414_v16 = vunpack.c.l.s8.bf16 %v118_v41 }
 0x12a   :  { %1274 = vmatprep.subr.bf16.mxu1 %v820_v17  ;;  %v82_v17 = vld [vmem:[#allocation5 + $0x38] sm:$0xff] }
 0x12b   :  { %v342_v19 = vunpack.c.l.s8.bf16 %v82_v17 }
 0x12c   :  { %1234 = vmatpush2.bf16.msra.mxu0 %v755_v21  ;;  %v410_v21 = vunpack.c.h.s8.bf16 %v114_v18 }
 0x12d   :  { %1275 = vmatpush2.bf16.msra.mxu1 %v819_v22  ;;  %1235 = vmatprep.subr.bf16.mxu0 %v752_v23  ;;  %v81_v22 = vld [vmem:[#allocation5 + $0x30] sm:$0xff] }
 0x12e   :  { %1276 = vmatprep.subr.bf16.mxu1 %v816_v25  ;;  %v113_v23 = vld [vmem:[#allocation5 + $0x130] sm:$0xff]  ;;  %v345_v25 = vunpack.c.h.s8.bf16 %v81_v22 }
 0x12f   :  { %v409_v28 = vunpack.c.h.s8.bf16 %v113_v23  ;;  %v405_v34 = vunpack.c.l.s8.bf16 %v113_v23  ;;  %v97_v23 = vld [vmem:[#allocation5 + $0xb0] sm:$0xff] }
 0x130   :  { %1236 = vmatpush2.bf16.msra.mxu0 %v751_v29  ;;  %v406_v29 = vunpack.c.l.s8.bf16 %v114_v18  ;;  %v98_v18 = vld [vmem:[#allocation5 + $0xb8] sm:$0xff] }
 0x131   :  { %1277 = vmatpush2.bf16.msra.mxu1 %v815_v30  ;;  %1237 = vmatprep.subr.bf16.mxu0 %v748_v31  ;;  %v78_v30 = vld [vmem:[#allocation5 + $0x18] sm:$0xff] }
 0x132   :  { %1278 = vmatprep.subr.bf16.mxu1 %v812_v32  ;;  %v110_v31 = vld [vmem:[#allocation5 + $0x118] sm:$0xff]  ;;  %v341_v32 = vunpack.c.l.s8.bf16 %v81_v22  ;;  %v338_v38 = vunpack.c.h.s8.bf16 %v78_v30  ;;  %v334_v48 = vunpack.c.l.s8.bf16 %v78_v30 }
 0x134   :  { %1238 = vmatpush2.bf16.msra.mxu0 %v747_v40  ;;  %v402_v40 = vunpack.c.h.s8.bf16 %v110_v31 }
 0x135   :  { %1279 = vmatpush2.bf16.msra.mxu1 %v811_v43  ;;  %1289 = vmatprep.subr.bf16.mxu0 %v362_v44  ;;  %v77_v43 = vld [vmem:[#allocation5 + $0x10] sm:$0xff] }
 0x136   :  { %1330 = vmatprep.subr.bf16.mxu1 %v426_v27  ;;  %v109_v44 = vld [vmem:[#allocation5 + $0x110] sm:$0xff]  ;;  %v337_v27 = vunpack.c.h.s8.bf16 %v77_v43 }
 0x137   :  { %v995_v60 = vpop.f32.mrf.mxu0  ;;  %1240 = vmatmul.mubr.bf16.vlgmr.msra.gmra.mxu0 %v2147_v39  ;;  %v401_v47 = vunpack.c.h.s8.bf16 %v109_v44  ;;  %v397_v57 = vunpack.c.l.s8.bf16 %v109_v44  ;;  %v93_v44 = vld [vmem:[#allocation5 + $0x90] sm:$0xff] }
 0x138   :  { %v1036_v61 = vpop.f32.mrf.mxu1  ;;  %1281 = vmatmul.mubr.bf16.vlgmr.msra.gmra.mxu1 %v2151_v50  ;;  %1290 = vmatpush1.bf16.msra.mxu0 %v361_v53  ;;  %v398_v53 = vunpack.c.l.s8.bf16 %v110_v31  ;;  %v94_v31 = vld [vmem:[#allocation5 + $0x98] sm:$0xff] }
 0x139   :  { %v2155_v62 = vadd.f32 %v1036_v61, %v995_v60  ;;  %1331 = vmatpush1.bf16.msra.mxu1 %v425_v54  ;;  %v997_v2 = vpop.f32.mrf.mxu0  ;;  %1291 = vmatprep.subr.bf16.mxu0 %v358_v35  ;;  %v106_v54 = vld [vmem:[#allocation5 + $0xf8] sm:$0xff]  ;;  %v105_v61 = vld [vmem:[#allocation5 + $0xf0] sm:$0xff] }
 0x13a   :  { %v1038_v3 = vpop.f32.mrf.mxu1  ;;  %1332 = vmatprep.subr.bf16.mxu1 %v422_v24  ;;  %1321 = vmatprep.mubr.bf16.mxu0 %v2058_v51  ;;  %v413_v51 = vunpack.c.l.s8.bf16 %v117_v7  ;;  %v138_v35 = vld [vmem:[#allocation5 + $0x1f8] sm:$0xff]  ;;  %v333_v24 = vunpack.c.l.s8.bf16 %v77_v43  ;;  %v394_v41 = vunpack.c.h.s8.bf16 %v106_v54  ;;  %v389_v7 = vunpack.c.l.s8.bf16 %v105_v61 }
 0x13b   :  { %v2157_v8 = vadd.f32 %v1038_v3, %v997_v2  ;;  %1362 = vmatprep.mubr.bf16.mxu1 %v2063_v52  ;;  %v999_v9 = vpop.f32.mrf.mxu0  ;;  %v346_v52 = vunpack.c.h.s8.bf16 %v82_v17  ;;  %v458_v60 = vunpack.c.h.s8.bf16 %v138_v35  ;;  %v390_v3 = vunpack.c.l.s8.bf16 %v106_v54 }
 0x13c   :  { %v1040_v10 = vpop.f32.mrf.mxu1  ;;  %1292 = vmatpush1.bf16.msra.mxu0 %v357_v63  ;;  %v137_v63 = vld [vmem:[#allocation5 + $0x1f0] sm:$0xff]  ;;  %v446_v17 = vunpack.c.l.s8.bf16 %v134_v6 }
 0x13d   :  { %1333 = vmatpush1.bf16.msra.mxu1 %v421_v0  ;;  %v1000_v13 = vpop.f32.mrf.mxu0  ;;  %1293 = vmatprep.subr.bf16.mxu0 %v354_v4  ;;  %v393_v0 = vunpack.c.h.s8.bf16 %v105_v61  ;;  %v457_v2 = vunpack.c.h.s8.bf16 %v137_v63  ;;  %v454_v4 = vunpack.c.l.s8.bf16 %v138_v35  ;;  %v453_v9 = vunpack.c.l.s8.bf16 %v137_v63  ;;  %v154_v35 = vld [vmem:[#allocation5 + $0x278] sm:$0xff]  ;;  %v153_v63 = vld [vmem:[#allocation5 + $0x270] sm:$0xff] }
 0x13e   :  { %v1041_v14 = vpop.f32.mrf.mxu1  ;;  %1334 = vmatprep.subr.bf16.mxu1 %v418_v5  ;;  %v102_v5 = vld [vmem:[#allocation5 + $0xd8] sm:$0xff]  ;;  %v133_v13 = vld [vmem:[#allocation5 + $0x1d0] sm:$0xff] }
 0x13f   :  { %v386_v10 = vunpack.c.h.s8.bf16 %v102_v5 }
 0x140   :  { %1294 = vmatpush1.bf16.msra.mxu0 %v353_v11  ;;  %v450_v11 = vunpack.c.h.s8.bf16 %v134_v6  ;;  %v150_v6 = vld [vmem:[#allocation5 + $0x258] sm:$0xff] }
 0x141   :  { %1335 = vmatpush1.bf16.msra.mxu1 %v417_v12  ;;  %1295 = vmatprep.subr.bf16.mxu0 %v350_v15  ;;  %v101_v12 = vld [vmem:[#allocation5 + $0xd0] sm:$0xff]  ;;  %v449_v15 = vunpack.c.h.s8.bf16 %v133_v13 }
 0x142   :  { %1336 = vmatprep.subr.bf16.mxu1 %v414_v16  ;;  %v385_v14 = vunpack.c.h.s8.bf16 %v101_v12  ;;  %v382_v16 = vunpack.c.l.s8.bf16 %v102_v5 }
 0x144   :  { %1296 = vmatpush1.bf16.msra.mxu0 %v349_v20  ;;  %v130_v20 = vld [vmem:[#allocation5 + $0x1b8] sm:$0xff] }
 0x145   :  { %1337 = vmatpush1.bf16.msra.mxu1 %v413_v51  ;;  %1297 = vmatprep.subr.bf16.mxu0 %v346_v52  ;;  %v381_v51 = vunpack.c.l.s8.bf16 %v101_v12  ;;  %v445_v52 = vunpack.c.l.s8.bf16 %v133_v13  ;;  %v442_v22 = vunpack.c.h.s8.bf16 %v130_v20  ;;  %v438_v30 = vunpack.c.l.s8.bf16 %v130_v20  ;;  %v181_v20 = vld [vmem:[#allocation5 + $0x350] sm:$0xff] }
 0x146   :  { %1338 = vmatprep.subr.bf16.mxu1 %v410_v21  ;;  %v378_v21 = vunpack.c.h.s8.bf16 %v98_v18  ;;  %v485_v12 = vunpack.c.l.s8.bf16 %v153_v63 }
 0x148   :  { %1298 = vmatpush1.bf16.msra.mxu0 %v345_v25  ;;  %v129_v25 = vld [vmem:[#allocation5 + $0x1b0] sm:$0xff] }
 0x149   :  { %1339 = vmatpush1.bf16.msra.mxu1 %v409_v28  ;;  %1299 = vmatprep.subr.bf16.mxu0 %v342_v19  ;;  %v377_v28 = vunpack.c.h.s8.bf16 %v97_v23  ;;  %v441_v19 = vunpack.c.h.s8.bf16 %v129_v25 }
 0x14a   :  { %1340 = vmatprep.subr.bf16.mxu1 %v406_v29  ;;  %v374_v29 = vunpack.c.l.s8.bf16 %v98_v18  ;;  %v149_v18 = vld [vmem:[#allocation5 + $0x250] sm:$0xff] }
 0x14c   :  { %1300 = vmatpush1.bf16.msra.mxu0 %v341_v32  ;;  %v126_v32 = vld [vmem:[#allocation5 + $0x198] sm:$0xff] }
 0x14d   :  { %1341 = vmatpush1.bf16.msra.mxu1 %v405_v34  ;;  %1301 = vmatprep.subr.bf16.mxu0 %v338_v38  ;;  %v373_v34 = vunpack.c.l.s8.bf16 %v97_v23  ;;  %v437_v38 = vunpack.c.l.s8.bf16 %v129_v25  ;;  %v434_v43 = vunpack.c.h.s8.bf16 %v126_v32  ;;  %v430_v54 = vunpack.c.l.s8.bf16 %v126_v32  ;;  %v145_v32 = vld [vmem:[#allocation5 + $0x230] sm:$0xff] }
 0x14e   :  { %1342 = vmatprep.subr.bf16.mxu1 %v402_v40  ;;  %v370_v40 = vunpack.c.h.s8.bf16 %v94_v31 }
 0x150   :  { %1302 = vmatpush1.bf16.msra.mxu0 %v337_v27  ;;  %v125_v27 = vld [vmem:[#allocation5 + $0x190] sm:$0xff] }
 0x151   :  { %1343 = vmatpush1.bf16.msra.mxu1 %v401_v47  ;;  %1303 = vmatprep.subr.bf16.mxu0 %v334_v48  ;;  %v369_v47 = vunpack.c.h.s8.bf16 %v93_v44  ;;  %v433_v48 = vunpack.c.h.s8.bf16 %v125_v27 }
 0x152   :  { %1344 = vmatprep.subr.bf16.mxu1 %v398_v53  ;;  %v366_v53 = vunpack.c.l.s8.bf16 %v94_v31 }
 0x154   :  { %1304 = vmatpush1.bf16.msra.mxu0 %v333_v24  ;;  %v186_v24 = vld [vmem:[#allocation5 + $0x378] sm:$0xff] }
 0x155   :  { %1345 = vmatpush1.bf16.msra.mxu1 %v397_v57  ;;  %1305 = vmatprep.subr.bf16.mxu0 %v394_v41  ;;  %v365_v57 = vunpack.c.l.s8.bf16 %v93_v44  ;;  %v429_v41 = vunpack.c.l.s8.bf16 %v125_v27  ;;  %v554_v61 = vunpack.c.h.s8.bf16 %v186_v24  ;;  %v550_v5 = vunpack.c.l.s8.bf16 %v186_v24  ;;  %v142_v27 = vld [vmem:[#allocation5 + $0x218] sm:$0xff]  ;;  %v141_v24 = vld [vmem:[#allocation5 + $0x210] sm:$0xff] }
 0x156   :  { %1346 = vmatprep.subr.bf16.mxu1 %v458_v60  ;;  %v490_v60 = vunpack.c.h.s8.bf16 %v154_v35 }
 0x158   :  { %1306 = vmatpush2.bf16.msra.mxu0 %v393_v0  ;;  %v185_v0 = vld [vmem:[#allocation5 + $0x370] sm:$0xff] }
 0x159   :  { %1347 = vmatpush2.bf16.msra.mxu1 %v457_v2  ;;  %1307 = vmatprep.subr.bf16.mxu0 %v390_v3  ;;  %v489_v2 = vunpack.c.h.s8.bf16 %v153_v63  ;;  %v553_v3 = vunpack.c.h.s8.bf16 %v185_v0  ;;  %v549_v13 = vunpack.c.l.s8.bf16 %v185_v0  ;;  %v170_v0 = vld [vmem:[#allocation5 + $0x2f8] sm:$0xff] }
 0x15a   :  { %1348 = vmatprep.subr.bf16.mxu1 %v454_v4  ;;  %v486_v4 = vunpack.c.l.s8.bf16 %v154_v35 }
 0x15c   :  { %1308 = vmatpush2.bf16.msra.mxu0 %v389_v7  ;;  %v182_v7 = vld [vmem:[#allocation5 + $0x358] sm:$0xff] }
 0x15d   :  { %1349 = vmatpush2.bf16.msra.mxu1 %v453_v9  ;;  %1309 = vmatprep.subr.bf16.mxu0 %v386_v10 }
 0x15e   :  { %1350 = vmatprep.subr.bf16.mxu1 %v450_v11 }
 0x160   :  { %1310 = vmatpush2.bf16.msra.mxu0 %v385_v14 }
 0x161   :  { %1351 = vmatpush2.bf16.msra.mxu1 %v449_v15  ;;  %1311 = vmatprep.subr.bf16.mxu0 %v382_v16  ;;  %v482_v16 = vunpack.c.h.s8.bf16 %v150_v6 }
 0x162   :  { %1352 = vmatprep.subr.bf16.mxu1 %v446_v17  ;;  %v546_v17 = vunpack.c.h.s8.bf16 %v182_v7 }
 0x164   :  { %1312 = vmatpush2.bf16.msra.mxu0 %v381_v51 }
 0x165   :  { %1353 = vmatpush2.bf16.msra.mxu1 %v445_v52  ;;  %1313 = vmatprep.subr.bf16.mxu0 %v378_v21  ;;  %v481_v21 = vunpack.c.h.s8.bf16 %v149_v18 }
 0x166   :  { %1354 = vmatprep.subr.bf16.mxu1 %v442_v22  ;;  %v545_v22 = vunpack.c.h.s8.bf16 %v181_v20 }
 0x168   :  { %1314 = vmatpush2.bf16.msra.mxu0 %v377_v28  ;;  %v478_v28 = vunpack.c.l.s8.bf16 %v150_v6 }
 0x169   :  { %1355 = vmatpush2.bf16.msra.mxu1 %v441_v19  ;;  %1315 = vmatprep.subr.bf16.mxu0 %v374_v29  ;;  %v542_v19 = vunpack.c.l.s8.bf16 %v182_v7  ;;  %v146_v29 = vld [vmem:[#allocation5 + $0x238] sm:$0xff]  ;;  %v169_v7 = vld [vmem:[#allocation5 + $0x2f0] sm:$0xff] }
 0x16a   :  { %1356 = vmatprep.subr.bf16.mxu1 %v438_v30  ;;  %v474_v30 = vunpack.c.h.s8.bf16 %v146_v29 }
 0x16c   :  { %1316 = vmatpush2.bf16.msra.mxu0 %v373_v34  ;;  %v177_v34 = vld [vmem:[#allocation5 + $0x330] sm:$0xff] }
 0x16d   :  { %1357 = vmatpush2.bf16.msra.mxu1 %v437_v38  ;;  %1317 = vmatprep.subr.bf16.mxu0 %v370_v40  ;;  %v473_v38 = vunpack.c.h.s8.bf16 %v145_v32  ;;  %v537_v40 = vunpack.c.h.s8.bf16 %v177_v34 }
 0x16e   :  { %1358 = vmatprep.subr.bf16.mxu1 %v434_v43  ;;  %v470_v43 = vunpack.c.l.s8.bf16 %v146_v29 }
 0x170   :  { %1318 = vmatpush2.bf16.msra.mxu0 %v369_v47  ;;  %v174_v47 = vld [vmem:[#allocation5 + $0x318] sm:$0xff] }
 0x171   :  { %1359 = vmatpush2.bf16.msra.mxu1 %v433_v48  ;;  %1319 = vmatprep.subr.bf16.mxu0 %v366_v53  ;;  %v469_v48 = vunpack.c.l.s8.bf16 %v145_v32  ;;  %v533_v53 = vunpack.c.l.s8.bf16 %v177_v34  ;;  %v530_v35 = vunpack.c.h.s8.bf16 %v174_v47  ;;  %v526_v63 = vunpack.c.l.s8.bf16 %v174_v47 }
 0x172   :  { %1360 = vmatprep.subr.bf16.mxu1 %v430_v54  ;;  %v466_v54 = vunpack.c.h.s8.bf16 %v142_v27 }
 0x174   :  { %1320 = vmatpush2.bf16.msra.mxu0 %v365_v57  ;;  %v173_v57 = vld [vmem:[#allocation5 + $0x310] sm:$0xff] }
 0x175   :  { %1361 = vmatpush2.bf16.msra.mxu1 %v429_v41  ;;  %1371 = vmatprep.subr.bf16.mxu0 %v490_v60  ;;  %v465_v41 = vunpack.c.h.s8.bf16 %v141_v24  ;;  %v529_v60 = vunpack.c.h.s8.bf16 %v173_v57 }
 0x176   :  { %1412 = vmatprep.subr.bf16.mxu1 %v554_v61  ;;  %v462_v61 = vunpack.c.l.s8.bf16 %v142_v27 }
 0x177   :  { %v1077_v9 = vpop.f32.mrf.mxu0  ;;  %1322 = vmatmul.mubr.bf16.vlgmr.msra.gmra.mxu0 %v2075_v49 }
 0x178   :  { %v1118_v10 = vpop.f32.mrf.mxu1  ;;  %1363 = vmatmul.mubr.bf16.vlgmr.msra.gmra.mxu1 %v2082_v59  ;;  %v1078_v11 = vadd.f32 %v1077_v9, %v2155_v62  ;;  %1372 = vmatpush1.bf16.msra.mxu0 %v489_v2  ;;  %v202_v2 = vld [vmem:[#allocation5 + $0x3f8] sm:$0xff]  ;;  %v201_v9 = vld [vmem:[#allocation5 + $0x3f0] sm:$0xff] }
 0x179   :  { %1413 = vmatpush1.bf16.msra.mxu1 %v553_v3  ;;  %v1079_v14 = vpop.f32.mrf.mxu0  ;;  %1373 = vmatprep.subr.bf16.mxu0 %v486_v4  ;;  %v461_v3 = vunpack.c.l.s8.bf16 %v141_v24  ;;  %v525_v4 = vunpack.c.l.s8.bf16 %v173_v57  ;;  %v586_v6 = vunpack.c.h.s8.bf16 %v202_v2 }
 0x17a   :  { %v1120_v15 = vpop.f32.mrf.mxu1  ;;  %1414 = vmatprep.subr.bf16.mxu1 %v550_v5  ;;  %v2164_v51 = vadd.f32 %v1118_v10, %v1078_v11  ;;  %v1080_v49 = vadd.f32 %v1079_v14, %v2157_v8  ;;  %1403 = vmatprep.mubr.bf16.mxu0 %v2078_v58  ;;  %v178_v8 = vld [vmem:[#allocation5 + $0x338] sm:$0xff]  ;;  %v477_v58 = vunpack.c.l.s8.bf16 %v149_v18  ;;  %v522_v5 = vunpack.c.h.s8.bf16 %v170_v0 }
 0x17b   :  { %1444 = vmatprep.mubr.bf16.mxu1 %v2086_v1  ;;  %v1081_v59 = vpop.f32.mrf.mxu0  ;;  %v541_v1 = vunpack.c.l.s8.bf16 %v181_v20  ;;  %v538_v31 = vunpack.c.h.s8.bf16 %v178_v8  ;;  %v534_v44 = vunpack.c.l.s8.bf16 %v178_v8  ;;  %v521_v10 = vunpack.c.h.s8.bf16 %v169_v7  ;;  %v166_v14 = vld [vmem:[#allocation5 + $0x2d8] sm:$0xff] }
 0x17c   :  { %v1122_v62 = vpop.f32.mrf.mxu1  ;;  %v2169_v52 = vadd.f32 %v1120_v15, %v1080_v49  ;;  %1374 = vmatpush1.bf16.msra.mxu0 %v485_v12  ;;  %v585_v11 = vunpack.c.h.s8.bf16 %v201_v9  ;;  %v518_v12 = vunpack.c.l.s8.bf16 %v170_v0  ;;  %v198_v15 = vld [vmem:[#allocation5 + $0x3d8] sm:$0xff]  ;;  %v514_v18 = vunpack.c.h.s8.bf16 %v166_v14  ;;  %v165_v49 = vld [vmem:[#allocation5 + $0x2d0] sm:$0xff] }
 0x17d   :  { %1415 = vmatpush1.bf16.msra.mxu1 %v549_v13  ;;  %v1082_v23 = vpop.f32.mrf.mxu0  ;;  %1375 = vmatprep.subr.bf16.mxu0 %v482_v16  ;;  %v582_v13 = vunpack.c.l.s8.bf16 %v202_v2  ;;  %v517_v16 = vunpack.c.l.s8.bf16 %v169_v7  ;;  %v578_v20 = vunpack.c.h.s8.bf16 %v198_v15  ;;  %v197_v59 = vld [vmem:[#allocation5 + $0x3d0] sm:$0xff]  ;;  %v513_v62 = vunpack.c.h.s8.bf16 %v165_v49 }
 0x17e   :  { %v1123_v25 = vpop.f32.mrf.mxu1  ;;  %1416 = vmatprep.subr.bf16.mxu1 %v546_v17  ;;  %v581_v17 = vunpack.c.l.s8.bf16 %v201_v9  ;;  %v574_v23 = vunpack.c.l.s8.bf16 %v198_v15  ;;  %v573_v29 = vunpack.c.l.s8.bf16 %v197_v59 }
 0x17f   :  { %v162_v25 = vld [vmem:[#allocation5 + $0x2b8] sm:$0xff] }
 0x180   :  { %1376 = vmatpush1.bf16.msra.mxu0 %v481_v21  ;;  %v577_v21 = vunpack.c.h.s8.bf16 %v197_v59  ;;  %v506_v8 = vunpack.c.h.s8.bf16 %v162_v25  ;;  %v502_v34 = vunpack.c.l.s8.bf16 %v162_v25 }
 0x181   :  { %1417 = vmatpush1.bf16.msra.mxu1 %v545_v22  ;;  %1377 = vmatprep.subr.bf16.mxu0 %v478_v28  ;;  %v510_v22 = vunpack.c.l.s8.bf16 %v166_v14  ;;  %v194_v28 = vld [vmem:[#allocation5 + $0x3b8] sm:$0xff] }
 0x182   :  { %1418 = vmatprep.subr.bf16.mxu1 %v542_v19  ;;  %v509_v19 = vunpack.c.l.s8.bf16 %v165_v49 }
 0x184   :  { %1378 = vmatpush1.bf16.msra.mxu0 %v477_v58  ;;  %v570_v58 = vunpack.c.h.s8.bf16 %v194_v28 }
 0x185   :  { %1419 = vmatpush1.bf16.msra.mxu1 %v541_v1  ;;  %1379 = vmatprep.subr.bf16.mxu0 %v474_v30  ;;  %v161_v1 = vld [vmem:[#allocation5 + $0x2b0] sm:$0xff] }
 0x186   :  { %1420 = vmatprep.subr.bf16.mxu1 %v538_v31  ;;  %v193_v30 = vld [vmem:[#allocation5 + $0x3b0] sm:$0xff]  ;;  %v505_v31 = vunpack.c.h.s8.bf16 %v161_v1 }
 0x187   :  { %v569_v32 = vunpack.c.h.s8.bf16 %v193_v30  ;;  %v565_v27 = vunpack.c.l.s8.bf16 %v193_v30 }
 0x188   :  { %1380 = vmatpush1.bf16.msra.mxu0 %v473_v38  ;;  %v566_v38 = vunpack.c.l.s8.bf16 %v194_v28 }
 0x189   :  { %1421 = vmatpush1.bf16.msra.mxu1 %v537_v40  ;;  %1381 = vmatprep.subr.bf16.mxu0 %v470_v43  ;;  %v158_v40 = vld [vmem:[#allocation5 + $0x298] sm:$0xff] }
 0x18a   :  { %1422 = vmatprep.subr.bf16.mxu1 %v534_v44  ;;  %v190_v43 = vld [vmem:[#allocation5 + $0x398] sm:$0xff]  ;;  %v501_v44 = vunpack.c.l.s8.bf16 %v161_v1  ;;  %v498_v47 = vunpack.c.h.s8.bf16 %v158_v40  ;;  %v494_v57 = vunpack.c.l.s8.bf16 %v158_v40 }
 0x18b   :  { %v210_v1 = vld [vmem:[#allocation5 + $0x438] sm:$0xff] }
 0x18c   :  { %1382 = vmatpush1.bf16.msra.mxu0 %v469_v48  ;;  %v562_v48 = vunpack.c.h.s8.bf16 %v190_v43  ;;  %v602_v30 = vunpack.c.h.s8.bf16 %v210_v1 }
 0x18d   :  { %1423 = vmatpush1.bf16.msra.mxu1 %v533_v53  ;;  %1383 = vmatprep.subr.bf16.mxu0 %v466_v54  ;;  %v157_v53 = vld [vmem:[#allocation5 + $0x290] sm:$0xff] }
 0x18e   :  { %1424 = vmatprep.subr.bf16.mxu1 %v530_v35  ;;  %v189_v54 = vld [vmem:[#allocation5 + $0x390] sm:$0xff]  ;;  %v497_v35 = vunpack.c.h.s8.bf16 %v157_v53 }
 0x18f   :  { %v561_v24 = vunpack.c.h.s8.bf16 %v189_v54  ;;  %v557_v0 = vunpack.c.l.s8.bf16 %v189_v54 }
 0x190   :  { %1384 = vmatpush1.bf16.msra.mxu0 %v465_v41  ;;  %v558_v41 = vunpack.c.l.s8.bf16 %v190_v43  ;;  %v598_v43 = vunpack.c.l.s8.bf16 %v210_v1  ;;  %v257_v1 = vld [vmem:[#allocation5 + $0x5b0] sm:$0xff] }
 0x191   :  { %1425 = vmatpush1.bf16.msra.mxu1 %v529_v60  ;;  %1385 = vmatprep.subr.bf16.mxu0 %v462_v61  ;;  %v218_v60 = vld [vmem:[#allocation5 + $0x478] sm:$0xff] }
 0x192   :  { %1426 = vmatprep.subr.bf16.mxu1 %v526_v63  ;;  %v250_v61 = vld [vmem:[#allocation5 + $0x578] sm:$0xff]  ;;  %v493_v63 = vunpack.c.l.s8.bf16 %v157_v53  ;;  %v618_v2 = vunpack.c.h.s8.bf16 %v218_v60  ;;  %v614_v9 = vunpack.c.l.s8.bf16 %v218_v60 }
 0x194   :  { %1386 = vmatpush1.bf16.msra.mxu0 %v461_v3  ;;  %v682_v3 = vunpack.c.h.s8.bf16 %v250_v61 }
 0x195   :  { %1427 = vmatpush1.bf16.msra.mxu1 %v525_v4  ;;  %1387 = vmatprep.subr.bf16.mxu0 %v522_v5  ;;  %v217_v4 = vld [vmem:[#allocation5 + $0x470] sm:$0xff] }
 0x196   :  { %1428 = vmatprep.subr.bf16.mxu1 %v586_v6  ;;  %v249_v5 = vld [vmem:[#allocation5 + $0x570] sm:$0xff]  ;;  %v617_v6 = vunpack.c.h.s8.bf16 %v217_v4 }
 0x197   :  { %v681_v7 = vunpack.c.h.s8.bf16 %v249_v5 }
 0x198   :  { %1388 = vmatpush2.bf16.msra.mxu0 %v521_v10  ;;  %v678_v10 = vunpack.c.l.s8.bf16 %v250_v61 }
 0x199   :  { %1429 = vmatpush2.bf16.msra.mxu1 %v585_v11  ;;  %1389 = vmatprep.subr.bf16.mxu0 %v518_v12  ;;  %v214_v11 = vld [vmem:[#allocation5 + $0x458] sm:$0xff] }
 0x19a   :  { %1430 = vmatprep.subr.bf16.mxu1 %v582_v13  ;;  %v246_v12 = vld [vmem:[#allocation5 + $0x558] sm:$0xff]  ;;  %v610_v49 = vunpack.c.h.s8.bf16 %v214_v11 }
 0x19b   :  { %v674_v59 = vunpack.c.h.s8.bf16 %v246_v12 }
 0x19c   :  { %1390 = vmatpush2.bf16.msra.mxu0 %v517_v16  ;;  %v613_v16 = vunpack.c.l.s8.bf16 %v217_v4 }
 0x19d   :  { %1431 = vmatpush2.bf16.msra.mxu1 %v581_v17  ;;  %1391 = vmatprep.subr.bf16.mxu0 %v514_v18  ;;  %v677_v17 = vunpack.c.l.s8.bf16 %v249_v5 }
 0x19e   :  { %1432 = vmatprep.subr.bf16.mxu1 %v578_v20 }
 0x1a0   :  { %1392 = vmatpush2.bf16.msra.mxu0 %v513_v62  ;;  %v213_v62 = vld [vmem:[#allocation5 + $0x450] sm:$0xff] }
 0x1a1   :  { %1433 = vmatpush2.bf16.msra.mxu1 %v577_v21  ;;  %1393 = vmatprep.subr.bf16.mxu0 %v510_v22  ;;  %v245_v21 = vld [vmem:[#allocation5 + $0x550] sm:$0xff]  ;;  %v609_v25 = vunpack.c.h.s8.bf16 %v213_v62 }
 0x1a2   :  { %1434 = vmatprep.subr.bf16.mxu1 %v574_v23  ;;  %v673_v28 = vunpack.c.h.s8.bf16 %v245_v21 }
 0x1a4   :  { %1394 = vmatpush2.bf16.msra.mxu0 %v509_v19 }
 0x1a5   :  { %1435 = vmatpush2.bf16.msra.mxu1 %v573_v29  ;;  %1395 = vmatprep.subr.bf16.mxu0 %v506_v8  ;;  %v606_v8 = vunpack.c.l.s8.bf16 %v214_v11 }
 0x1a6   :  { %1436 = vmatprep.subr.bf16.mxu1 %v570_v58  ;;  %v670_v58 = vunpack.c.l.s8.bf16 %v246_v12 }
 0x1a8   :  { %1396 = vmatpush2.bf16.msra.mxu0 %v505_v31 }
 0x1a9   :  { %1437 = vmatpush2.bf16.msra.mxu1 %v569_v32  ;;  %1397 = vmatprep.subr.bf16.mxu0 %v502_v34  ;;  %v209_v32 = vld [vmem:[#allocation5 + $0x430] sm:$0xff] }
 0x1aa   :  { %1438 = vmatprep.subr.bf16.mxu1 %v566_v38  ;;  %v241_v34 = vld [vmem:[#allocation5 + $0x530] sm:$0xff]  ;;  %v601_v38 = vunpack.c.h.s8.bf16 %v209_v32 }
 0x1ab   :  { %v665_v40 = vunpack.c.h.s8.bf16 %v241_v34  ;;  %v661_v53 = vunpack.c.l.s8.bf16 %v241_v34 }
 0x1ac   :  { %1398 = vmatpush2.bf16.msra.mxu0 %v501_v44 }
 0x1ad   :  { %1439 = vmatpush2.bf16.msra.mxu1 %v565_v27  ;;  %1399 = vmatprep.subr.bf16.mxu0 %v498_v47  ;;  %v206_v27 = vld [vmem:[#allocation5 + $0x418] sm:$0xff] }
 0x1ae   :  { %1440 = vmatprep.subr.bf16.mxu1 %v562_v48  ;;  %v238_v47 = vld [vmem:[#allocation5 + $0x518] sm:$0xff]  ;;  %v597_v48 = vunpack.c.l.s8.bf16 %v209_v32  ;;  %v594_v54 = vunpack.c.h.s8.bf16 %v206_v27  ;;  %v590_v61 = vunpack.c.l.s8.bf16 %v206_v27  ;;  %v253_v27 = vld [vmem:[#allocation5 + $0x590] sm:$0xff] }
 0x1af   :  { %v254_v32 = vld [vmem:[#allocation5 + $0x598] sm:$0xff] }
 0x1b0   :  { %1400 = vmatpush2.bf16.msra.mxu0 %v497_v35  ;;  %v658_v35 = vunpack.c.h.s8.bf16 %v238_v47 }
 0x1b1   :  { %1441 = vmatpush2.bf16.msra.mxu1 %v561_v24  ;;  %1401 = vmatprep.subr.bf16.mxu0 %v494_v57  ;;  %v205_v24 = vld [vmem:[#allocation5 + $0x410] sm:$0xff] }
 0x1b2   :  { %1442 = vmatprep.subr.bf16.mxu1 %v558_v41  ;;  %v237_v57 = vld [vmem:[#allocation5 + $0x510] sm:$0xff]  ;;  %v593_v41 = vunpack.c.h.s8.bf16 %v205_v24 }
 0x1b3   :  { %v657_v60 = vunpack.c.h.s8.bf16 %v237_v57  ;;  %v653_v4 = vunpack.c.l.s8.bf16 %v237_v57 }
 0x1b4   :  { %1402 = vmatpush2.bf16.msra.mxu0 %v493_v63  ;;  %v654_v63 = vunpack.c.l.s8.bf16 %v238_v47 }
 0x1b5   :  { %1443 = vmatpush2.bf16.msra.mxu1 %v557_v0  ;;  %1453 = vmatprep.subr.bf16.mxu0 %v618_v2  ;;  %v234_v0 = vld [vmem:[#allocation5 + $0x4f8] sm:$0xff] }
 0x1b6   :  { %1494 = vmatprep.subr.bf16.mxu1 %v682_v3  ;;  %v266_v2 = vld [vmem:[#allocation5 + $0x5f8] sm:$0xff]  ;;  %v589_v3 = vunpack.c.l.s8.bf16 %v205_v24  ;;  %v650_v5 = vunpack.c.h.s8.bf16 %v234_v0  ;;  %v646_v12 = vunpack.c.l.s8.bf16 %v234_v0  ;;  %v313_v0 = vld [vmem:[#allocation5 + $0x770] sm:$0xff] }
 0x1b7   :  { %v1159_v13 = vpop.f32.mrf.mxu0  ;;  %1404 = vmatmul.mubr.bf16.vlgmr.msra.gmra.mxu0 %v2102_v37  ;;  %v314_v24 = vld [vmem:[#allocation5 + $0x778] sm:$0xff] }
 0x1b8   :  { %v1200_v14 = vpop.f32.mrf.mxu1  ;;  %1445 = vmatmul.mubr.bf16.vlgmr.msra.gmra.mxu1 %v2109_v46  ;;  %v1160_v15 = vadd.f32 %v1159_v13, %v2164_v51  ;;  %1454 = vmatpush1.bf16.msra.mxu0 %v617_v6  ;;  %v714_v6 = vunpack.c.h.s8.bf16 %v266_v2  ;;  %v710_v13 = vunpack.c.l.s8.bf16 %v266_v2 }
 0x1b9   :  { %1495 = vmatpush1.bf16.msra.mxu1 %v681_v7  ;;  %v1161_v18 = vpop.f32.mrf.mxu0  ;;  %1455 = vmatprep.subr.bf16.mxu0 %v614_v9  ;;  %v233_v7 = vld [vmem:[#allocation5 + $0x4f0] sm:$0xff] }
 0x1ba   :  { %v1202_v20 = vpop.f32.mrf.mxu1  ;;  %1496 = vmatprep.subr.bf16.mxu1 %v678_v10  ;;  %v2174_v22 = vadd.f32 %v1200_v14, %v1160_v15  ;;  %v1162_v37 = vadd.f32 %v1161_v18, %v2169_v52  ;;  %1485 = vmatprep.mubr.bf16.mxu0 %v2105_v45  ;;  %v242_v52 = vld [vmem:[#allocation5 + $0x538] sm:$0xff]  ;;  %v605_v45 = vunpack.c.l.s8.bf16 %v213_v62  ;;  %v265_v9 = vld [vmem:[#allocation5 + $0x5f0] sm:$0xff]  ;;  %v649_v10 = vunpack.c.h.s8.bf16 %v233_v7 }
 0x1bb   :  { %1526 = vmatprep.mubr.bf16.mxu1 %v2113_v55  ;;  %v1163_v46 = vpop.f32.mrf.mxu0  ;;  %v669_v55 = vunpack.c.l.s8.bf16 %v245_v21  ;;  %v666_v31 = vunpack.c.h.s8.bf16 %v242_v52  ;;  %v662_v44 = vunpack.c.l.s8.bf16 %v242_v52  ;;  %v713_v11 = vunpack.c.h.s8.bf16 %v265_v9  ;;  %v230_v14 = vld [vmem:[#allocation5 + $0x4d8] sm:$0xff] }
 0x1bc   :  { %v1204_v51 = vpop.f32.mrf.mxu1  ;;  %v2179_v23 = vadd.f32 %v1202_v20, %v1162_v37  ;;  %1456 = vmatpush1.bf16.msra.mxu0 %v613_v16  ;;  %v262_v15 = vld [vmem:[#allocation5 + $0x5d8] sm:$0xff]  ;;  %v645_v16 = vunpack.c.l.s8.bf16 %v233_v7  ;;  %v642_v18 = vunpack.c.h.s8.bf16 %v230_v14  ;;  %v638_v37 = vunpack.c.l.s8.bf16 %v230_v14 }
 0x1bd   :  { %1497 = vmatpush1.bf16.msra.mxu1 %v677_v17  ;;  %v1164_v19 = vpop.f32.mrf.mxu0  ;;  %1457 = vmatprep.subr.bf16.mxu0 %v610_v49  ;;  %v709_v17 = vunpack.c.l.s8.bf16 %v265_v9  ;;  %v706_v20 = vunpack.c.h.s8.bf16 %v262_v15  ;;  %v229_v49 = vld [vmem:[#allocation5 + $0x4d0] sm:$0xff]  ;;  %v702_v46 = vunpack.c.l.s8.bf16 %v262_v15  ;;  %v226_v51 = vld [vmem:[#allocation5 + $0x4b8] sm:$0xff] }
 0x1be   :  { %v1205_v29 = vpop.f32.mrf.mxu1  ;;  %1498 = vmatprep.subr.bf16.mxu1 %v674_v59  ;;  %v261_v59 = vld [vmem:[#allocation5 + $0x5d0] sm:$0xff]  ;;  %v641_v62 = vunpack.c.h.s8.bf16 %v229_v49  ;;  %v310_v7 = vld [vmem:[#allocation5 + $0x758] sm:$0xff] }
 0x1bf   :  { %v705_v21 = vunpack.c.h.s8.bf16 %v261_v59  ;;  %v701_v19 = vunpack.c.l.s8.bf16 %v261_v59  ;;  %v634_v29 = vunpack.c.h.s8.bf16 %v226_v51 }
 0x1c0   :  { %1458 = vmatpush1.bf16.msra.mxu0 %v609_v25  ;;  %v258_v25 = vld [vmem:[#allocation5 + $0x5b8] sm:$0xff] }
 0x1c1   :  { %1499 = vmatpush1.bf16.msra.mxu1 %v673_v28  ;;  %1459 = vmatprep.subr.bf16.mxu0 %v606_v8  ;;  %v637_v28 = vunpack.c.l.s8.bf16 %v229_v49  ;;  %v698_v8 = vunpack.c.h.s8.bf16 %v258_v25 }
 0x1c2   :  { %1500 = vmatprep.subr.bf16.mxu1 %v670_v58  ;;  %v225_v58 = vld [vmem:[#allocation5 + $0x4b0] sm:$0xff] }
 0x1c3   :  { %v633_v52 = vunpack.c.h.s8.bf16 %v225_v58  ;;  %v629_v34 = vunpack.c.l.s8.bf16 %v225_v58 }
 0x1c4   :  { %1460 = vmatpush1.bf16.msra.mxu0 %v605_v45  ;;  %v697_v45 = vunpack.c.h.s8.bf16 %v257_v1 }
 0x1c5   :  { %1501 = vmatpush1.bf16.msra.mxu1 %v669_v55  ;;  %1461 = vmatprep.subr.bf16.mxu0 %v602_v30  ;;  %v630_v55 = vunpack.c.l.s8.bf16 %v226_v51  ;;  %v694_v30 = vunpack.c.l.s8.bf16 %v258_v25  ;;  %v274_v51 = vld [vmem:[#allocation5 + $0x638] sm:$0xff] }
 0x1c6   :  { %1502 = vmatprep.subr.bf16.mxu1 %v666_v31  ;;  %v222_v31 = vld [vmem:[#allocation5 + $0x498] sm:$0xff] }
 0x1c7   :  { %v306_v25 = vld [vmem:[#allocation5 + $0x738] sm:$0xff] }
 0x1c8   :  { %1462 = vmatpush1.bf16.msra.mxu0 %v601_v38  ;;  %v693_v38 = vunpack.c.l.s8.bf16 %v257_v1 }
 0x1c9   :  { %1503 = vmatpush1.bf16.msra.mxu1 %v665_v40  ;;  %1463 = vmatprep.subr.bf16.mxu0 %v598_v43  ;;  %v626_v40 = vunpack.c.h.s8.bf16 %v222_v31  ;;  %v690_v43 = vunpack.c.h.s8.bf16 %v254_v32 }
 0x1ca   :  { %1504 = vmatprep.subr.bf16.mxu1 %v662_v44  ;;  %v221_v44 = vld [vmem:[#allocation5 + $0x490] sm:$0xff] }
 0x1cb   :  { %v625_v47 = vunpack.c.h.s8.bf16 %v221_v44  ;;  %v621_v57 = vunpack.c.l.s8.bf16 %v221_v44 }
 0x1cc   :  { %1464 = vmatpush1.bf16.msra.mxu0 %v597_v48  ;;  %v689_v48 = vunpack.c.h.s8.bf16 %v253_v27 }
 0x1cd   :  { %1505 = vmatpush1.bf16.msra.mxu1 %v661_v53  ;;  %1465 = vmatprep.subr.bf16.mxu0 %v594_v54  ;;  %v622_v53 = vunpack.c.l.s8.bf16 %v222_v31  ;;  %v686_v54 = vunpack.c.l.s8.bf16 %v254_v32 }
 0x1ce   :  { %1506 = vmatprep.subr.bf16.mxu1 %v658_v35  ;;  %v282_v35 = vld [vmem:[#allocation5 + $0x678] sm:$0xff] }
 0x1d0   :  { %1466 = vmatpush1.bf16.msra.mxu0 %v593_v41  ;;  %v685_v41 = vunpack.c.l.s8.bf16 %v253_v27 }
 0x1d1   :  { %1507 = vmatpush1.bf16.msra.mxu1 %v657_v60  ;;  %1467 = vmatprep.subr.bf16.mxu0 %v590_v61  ;;  %v746_v60 = vunpack.c.h.s8.bf16 %v282_v35  ;;  %v810_v61 = vunpack.c.h.s8.bf16 %v314_v24 }
 0x1d2   :  { %1508 = vmatprep.subr.bf16.mxu1 %v654_v63  ;;  %v281_v63 = vld [vmem:[#allocation5 + $0x670] sm:$0xff] }
 0x1d3   :  { %v745_v2 = vunpack.c.h.s8.bf16 %v281_v63 }
 0x1d4   :  { %1468 = vmatpush1.bf16.msra.mxu0 %v589_v3  ;;  %v809_v3 = vunpack.c.h.s8.bf16 %v313_v0 }
 0x1d5   :  { %1509 = vmatpush1.bf16.msra.mxu1 %v653_v4  ;;  %1469 = vmatprep.subr.bf16.mxu0 %v650_v5  ;;  %v742_v4 = vunpack.c.l.s8.bf16 %v282_v35  ;;  %v806_v5 = vunpack.c.l.s8.bf16 %v314_v24 }
 0x1d6   :  { %1510 = vmatprep.subr.bf16.mxu1 %v714_v6  ;;  %v278_v6 = vld [vmem:[#allocation5 + $0x658] sm:$0xff] }
 0x1d8   :  { %1470 = vmatpush2.bf16.msra.mxu0 %v649_v10 }
 0x1d9   :  { %1511 = vmatpush2.bf16.msra.mxu1 %v713_v11  ;;  %1471 = vmatprep.subr.bf16.mxu0 %v646_v12  ;;  %v741_v12 = vunpack.c.l.s8.bf16 %v281_v63 }
 0x1da   :  { %1512 = vmatprep.subr.bf16.mxu1 %v710_v13  ;;  %v805_v13 = vunpack.c.l.s8.bf16 %v313_v0 }
 0x1dc   :  { %1472 = vmatpush2.bf16.msra.mxu0 %v645_v16  ;;  %v738_v16 = vunpack.c.h.s8.bf16 %v278_v6 }
 0x1dd   :  { %1513 = vmatpush2.bf16.msra.mxu1 %v709_v17  ;;  %1473 = vmatprep.subr.bf16.mxu0 %v642_v18  ;;  %v802_v17 = vunpack.c.h.s8.bf16 %v310_v7  ;;  %v277_v18 = vld [vmem:[#allocation5 + $0x650] sm:$0xff] }
 0x1de   :  { %1514 = vmatprep.subr.bf16.mxu1 %v706_v20  ;;  %v309_v20 = vld [vmem:[#allocation5 + $0x750] sm:$0xff] }
 0x1df   :  { %v801_v59 = vunpack.c.h.s8.bf16 %v309_v20 }
 0x1e0   :  { %1474 = vmatpush2.bf16.msra.mxu0 %v641_v62 }
 0x1e1   :  { %1515 = vmatpush2.bf16.msra.mxu1 %v705_v21  ;;  %1475 = vmatprep.subr.bf16.mxu0 %v638_v37  ;;  %v734_v37 = vunpack.c.l.s8.bf16 %v278_v6 }
 0x1e2   :  { %1516 = vmatprep.subr.bf16.mxu1 %v702_v46  ;;  %v798_v46 = vunpack.c.l.s8.bf16 %v310_v7 }
 0x1e4   :  { %1476 = vmatpush2.bf16.msra.mxu0 %v637_v28  ;;  %v733_v28 = vunpack.c.l.s8.bf16 %v277_v18 }
 0x1e5   :  { %1517 = vmatpush2.bf16.msra.mxu1 %v701_v19  ;;  %1477 = vmatprep.subr.bf16.mxu0 %v634_v29  ;;  %v794_v19 = vunpack.c.h.s8.bf16 %v306_v25  ;;  %v273_v29 = vld [vmem:[#allocation5 + $0x630] sm:$0xff] }
 0x1e6   :  { %1518 = vmatprep.subr.bf16.mxu1 %v698_v8  ;;  %v305_v8 = vld [vmem:[#allocation5 + $0x730] sm:$0xff]  ;;  %v729_v58 = vunpack.c.h.s8.bf16 %v273_v29  ;;  %v725_v31 = vunpack.c.l.s8.bf16 %v273_v29 }
 0x1e7   :  { %v793_v1 = vunpack.c.h.s8.bf16 %v305_v8  ;;  %v789_v32 = vunpack.c.l.s8.bf16 %v305_v8 }
 0x1e8   :  { %1478 = vmatpush2.bf16.msra.mxu0 %v633_v52  ;;  %v726_v52 = vunpack.c.l.s8.bf16 %v274_v51 }
 0x1e9   :  { %1519 = vmatpush2.bf16.msra.mxu1 %v697_v45  ;;  %1479 = vmatprep.subr.bf16.mxu0 %v630_v55  ;;  %v790_v45 = vunpack.c.l.s8.bf16 %v306_v25  ;;  %v270_v55 = vld [vmem:[#allocation5 + $0x618] sm:$0xff] }
 0x1ea   :  { %1520 = vmatprep.subr.bf16.mxu1 %v694_v30  ;;  %v302_v30 = vld [vmem:[#allocation5 + $0x718] sm:$0xff] }
 0x1ec   :  { %1480 = vmatpush2.bf16.msra.mxu0 %v629_v34  ;;  %v722_v34 = vunpack.c.h.s8.bf16 %v270_v55 }
 0x1ed   :  { %1521 = vmatpush2.bf16.msra.mxu1 %v693_v38  ;;  %1481 = vmatprep.subr.bf16.mxu0 %v626_v40  ;;  %v786_v38 = vunpack.c.h.s8.bf16 %v302_v30  ;;  %v269_v40 = vld [vmem:[#allocation5 + $0x610] sm:$0xff] }
 0x1ee   :  { %1522 = vmatprep.subr.bf16.mxu1 %v690_v43  ;;  %v301_v43 = vld [vmem:[#allocation5 + $0x710] sm:$0xff]  ;;  %v721_v44 = vunpack.c.h.s8.bf16 %v269_v40  ;;  %v717_v35 = vunpack.c.l.s8.bf16 %v269_v40 }
 0x1ef   :  { %v785_v27 = vunpack.c.h.s8.bf16 %v301_v43  ;;  %v781_v24 = vunpack.c.l.s8.bf16 %v301_v43 }
 0x1f0   :  { %1482 = vmatpush2.bf16.msra.mxu0 %v625_v47  ;;  %v718_v47 = vunpack.c.l.s8.bf16 %v270_v55 }
 0x1f1   :  { %1523 = vmatpush2.bf16.msra.mxu1 %v689_v48  ;;  %1483 = vmatprep.subr.bf16.mxu0 %v622_v53  ;;  %v782_v48 = vunpack.c.l.s8.bf16 %v302_v30  ;;  %v298_v53 = vld [vmem:[#allocation5 + $0x6f8] sm:$0xff]  ;;  %v285_v30 = vld [vmem:[#allocation5 + $0x690] sm:$0xff] }
 0x1f2   :  { %1524 = vmatprep.subr.bf16.mxu1 %v686_v54  ;;  %v330_v54 = vld [vmem:[#allocation5 + $0x7f8] sm:$0xff] }
 0x1f4   :  { %1484 = vmatpush2.bf16.msra.mxu0 %v621_v57  ;;  %v778_v57 = vunpack.c.h.s8.bf16 %v298_v53 }
 0x1f5   :  { %1525 = vmatpush2.bf16.msra.mxu1 %v685_v41  ;;  %1535 = vmatprep.subr.bf16.mxu0 %v746_v60  ;;  %v842_v41 = vunpack.c.h.s8.bf16 %v330_v54  ;;  %v297_v60 = vld [vmem:[#allocation5 + $0x6f0] sm:$0xff] }
 0x1f6   :  { %1576 = vmatprep.subr.bf16.mxu1 %v810_v61  ;;  %v329_v61 = vld [vmem:[#allocation5 + $0x7f0] sm:$0xff]  ;;  %v777_v63 = vunpack.c.h.s8.bf16 %v297_v60  ;;  %v773_v6 = vunpack.c.l.s8.bf16 %v297_v60 }
 0x1f7   :  { %v1241_v9 = vpop.f32.mrf.mxu0  ;;  %1486 = vmatmul.mubr.bf16.vlgmr.msra.gmra.mxu0 %v2128_v33  ;;  %v841_v0 = vunpack.c.h.s8.bf16 %v329_v61  ;;  %v837_v7 = vunpack.c.l.s8.bf16 %v329_v61  ;;  %v1677_v60 = vld [vmem:[#allocation7 + $0x30] sm:$0xff] }
 0x1f8   :  { %v1282_v10 = vpop.f32.mrf.mxu1  ;;  %1527 = vmatmul.mubr.bf16.vlgmr.msra.gmra.mxu1 %v2135_v42  ;;  %v1242_v11 = vadd.f32 %v1241_v9, %v2174_v22  ;;  %1536 = vmatpush1.bf16.msra.mxu0 %v745_v2  ;;  %v737_v22 = vunpack.c.h.s8.bf16 %v277_v18  ;;  %v774_v2 = vunpack.c.l.s8.bf16 %v298_v53 }
 0x1f9   :  { %1577 = vmatpush1.bf16.msra.mxu1 %v809_v3  ;;  %v2184_v14 = vpop.f32.mrf.mxu0  ;;  %1537 = vmatprep.subr.bf16.mxu0 %v742_v4  ;;  %v838_v3 = vunpack.c.l.s8.bf16 %v330_v54  ;;  %v294_v4 = vld [vmem:[#allocation5 + $0x6d8] sm:$0xff] }
 0x1fa   :  { %v2186_v15 = vpop.f32.mrf.mxu1  ;;  %1578 = vmatprep.subr.bf16.mxu1 %v806_v5  ;;  %v2188_v49 = vadd.f32 %v1282_v10, %v1242_v11  ;;  %1567 = vmatprep.mubr.bf16.mxu0 %v2131_v36  ;;  %v797_v36 = vunpack.c.l.s8.bf16 %v309_v20  ;;  %v326_v5 = vld [vmem:[#allocation5 + $0x7d8] sm:$0xff]  ;;  %v770_v9 = vunpack.c.h.s8.bf16 %v294_v4  ;;  %v293_v11 = vld [vmem:[#allocation5 + $0x6d0] sm:$0xff] }
 0x1fb   :  { %1608 = vmatprep.mubr.bf16.mxu1 %v2139_v56  ;;  %v1245_v33 = vpop.f32.mrf.mxu0  ;;  %v730_v56 = vunpack.c.h.s8.bf16 %v274_v51  ;;  %v834_v10 = vunpack.c.h.s8.bf16 %v326_v5  ;;  %v830_v18 = vunpack.c.l.s8.bf16 %v326_v5  ;;  %v290_v20 = vld [vmem:[#allocation5 + $0x6b8] sm:$0xff]  ;;  %v1624_v51 = vsub.s32 1, %v2044_v26 }
 0x1fc   :  { %v1286_v42 = vpop.f32.mrf.mxu1  ;;  %1538 = vmatpush1.bf16.msra.mxu0 %v741_v12  ;;  %v325_v12 = vld [vmem:[#allocation5 + $0x7d0] sm:$0xff]  ;;  %v322_v33 = vld [vmem:[#allocation5 + $0x7b8] sm:$0xff]  ;;  %v1700_v5 = vunpack.c.h.s8.bf16 %v1677_v60 }
 0x1fd   :  { %1579 = vmatpush1.bf16.msra.mxu1 %v805_v13  ;;  %v1246_v62 = vpop.f32.mrf.mxu0  ;;  %1539 = vmatprep.subr.bf16.mxu0 %v738_v16  ;;  %v769_v13 = vunpack.c.h.s8.bf16 %v293_v11  ;;  %v833_v16 = vunpack.c.h.s8.bf16 %v325_v12  ;;  %v765_v42 = vunpack.c.l.s8.bf16 %v293_v11  ;;  %v1674_v54 = vld [vmem:[#allocation7 + $0x18] sm:$0xff] }
 0x1fe   :  { %v1287_v21 = vpop.f32.mrf.mxu1  ;;  %1580 = vmatprep.subr.bf16.mxu1 %v802_v17  ;;  %v766_v17 = vunpack.c.l.s8.bf16 %v294_v4  ;;  %v826_v62 = vunpack.c.h.s8.bf16 %v322_v33 }
 0x1ff   :  { %v289_v21 = vld [vmem:[#allocation5 + $0x6b0] sm:$0xff] }
 0x200   :  { %1540 = vmatpush1.bf16.msra.mxu0 %v737_v22  ;;  %v829_v22 = vunpack.c.l.s8.bf16 %v325_v12  ;;  %v761_v25 = vunpack.c.h.s8.bf16 %v289_v21 }
 0x201   :  { %1581 = vmatpush1.bf16.msra.mxu1 %v801_v59  ;;  %1541 = vmatprep.subr.bf16.mxu0 %v734_v37  ;;  %v762_v59 = vunpack.c.h.s8.bf16 %v290_v20  ;;  %v321_v37 = vld [vmem:[#allocation5 + $0x7b0] sm:$0xff] }
 0x202   :  { %1582 = vmatprep.subr.bf16.mxu1 %v798_v46  ;;  %v1244_v46 = vadd.f32 %v2184_v14, %v2179_v23  ;;  %v757_v23 = vunpack.c.l.s8.bf16 %v289_v21  ;;  %v821_v14 = vunpack.c.l.s8.bf16 %v321_v37  ;;  %v1672_v21 = vld [vmem:[#allocation7 + $0x8] sm:$0xff] }
 0x204   :  { %1542 = vmatpush1.bf16.msra.mxu0 %v733_v28  ;;  %v825_v28 = vunpack.c.h.s8.bf16 %v321_v37  ;;  %v1285_v29 = vadd.f32 %v2186_v15, %v1244_v46  ;;  %v753_v15 = vunpack.c.h.s8.bf16 %v285_v30 }
 0x205   :  { %1583 = vmatpush1.bf16.msra.mxu1 %v797_v36  ;;  %1543 = vmatprep.subr.bf16.mxu0 %v730_v56  ;;  %v2195_v36 = vld [vmem:[#allocation8] ss:$4 sm:$0xf]  ;;  %v758_v56 = vunpack.c.l.s8.bf16 %v290_v20 }
 0x206   :  { %1584 = vmatprep.subr.bf16.mxu1 %v794_v19  ;;  %v822_v19 = vunpack.c.l.s8.bf16 %v322_v33  ;;  %v1625_v8 = vrot.slane %v2195_v36, %v1624_v51 }
 0x208   :  { %1544 = vmatpush1.bf16.msra.mxu0 %v729_v58  ;;  %v286_v58 = vld [vmem:[#allocation5 + $0x698] sm:$0xff] }
 0x209   :  { %1585 = vmatpush1.bf16.msra.mxu1 %v793_v1  ;;  %1545 = vmatprep.subr.bf16.mxu0 %v726_v52  ;;  %v318_v1 = vld [vmem:[#allocation5 + $0x798] sm:$0xff]  ;;  %v2199_v52 = vld [vmem:[#allocation8 + $0x1] ss:$4 sm:$0xf]  ;;  %v750_v40 = vunpack.c.l.s8.bf16 %v286_v58 }
 0x20a   :  { %1586 = vmatprep.subr.bf16.mxu1 %v790_v45  ;;  %v754_v45 = vunpack.c.h.s8.bf16 %v286_v58  ;;  %v818_v55 = vunpack.c.h.s8.bf16 %v318_v1  ;;  %v814_v43 = vunpack.c.l.s8.bf16 %v318_v1  ;;  %v1689_v58 = vunpack.c.l.s8.bf16 %v1672_v21 }
 0x20c   :  { %1546 = vmatpush1.bf16.msra.mxu0 %v725_v31  ;;  %v317_v31 = vld [vmem:[#allocation5 + $0x790] sm:$0xff] }
 0x20d   :  { %1587 = vmatpush1.bf16.msra.mxu1 %v789_v32  ;;  %1547 = vmatprep.subr.bf16.mxu0 %v722_v34  ;;  %v1639_v32 = vmul.f32 %v1625_v8, %v1285_v29  ;;  %v1650_v34 = vrot.slane %v2199_v52, %v1624_v51  ;;  %v1681_v51 = vld [vmem:[#allocation7 + $0x50] sm:$0xff]  ;;  %v1675_v29 = vld [vmem:[#allocation7 + $0x20] sm:$0xff] }
 0x20e   :  { %1588 = vmatprep.subr.bf16.mxu1 %v786_v38  ;;  %v817_v38 = vunpack.c.h.s8.bf16 %v317_v31 }
 0x210   :  { %1548 = vmatpush1.bf16.msra.mxu0 %v721_v44  ;;  %v1664_v44 = vadd.f32 %v1650_v34, %v1639_v32  ;;  %v1695_v32 = vunpack.c.l.s8.bf16 %v1675_v29 }
 0x211   :  { %1589 = vmatpush1.bf16.msra.mxu1 %v785_v27  ;;  %1549 = vmatprep.subr.bf16.mxu0 %v718_v47  ;;  %v1678_v27 = vld [vmem:[#allocation7 + $0x38] sm:$0xff]  ;;  %v749_v47 = vunpack.c.l.s8.bf16 %v285_v30 }
 0x212   :  { %1590 = vmatprep.subr.bf16.mxu1 %v782_v48  ;;  %v813_v48 = vunpack.c.l.s8.bf16 %v317_v31  ;;  %v1702_v53 = vunpack.c.h.s8.bf16 %v1678_v27 }
 0x214   :  { %1550 = vmatpush1.bf16.msra.mxu0 %v717_v35  ;;  %v1668_v35 = vmax.f32 %v1664_v44, 0.0 }
 0x215   :  { %1591 = vmatpush1.bf16.msra.mxu1 %v781_v24  ;;  %1551 = vmatprep.subr.bf16.mxu0 %v778_v57  ;;  %v1694_v24 = vunpack.c.h.s8.bf16 %v1674_v54  ;;  %v1701_v57 = vunpack.c.l.s8.bf16 %v1678_v27 }
 0x216   :  { %1592 = vmatprep.subr.bf16.mxu1 %v842_v41  ;;  %v1720_v41 = vpack.c.bf16 %v1668_v35, %v1668_v35 }
 0x218   :  { %1552 = vmatpush2.bf16.msra.mxu0 %v777_v63 }
 0x219   :  { %1593 = vmatpush2.bf16.msra.mxu1 %v841_v0  ;;  %1553 = vmatprep.subr.bf16.mxu0 %v774_v2  ;;  %v1693_v2 = vunpack.c.l.s8.bf16 %v1674_v54 }
 0x21a   :  { %1594 = vmatprep.subr.bf16.mxu1 %v838_v3 }
 0x21c   :  { %1554 = vmatpush2.bf16.msra.mxu0 %v773_v6  ;;  %v1673_v6 = vld [vmem:[#allocation7 + $0x10] sm:$0xff] }
 0x21d   :  { %1595 = vmatpush2.bf16.msra.mxu1 %v837_v7  ;;  %1555 = vmatprep.subr.bf16.mxu0 %v770_v9  ;;  %v1692_v11 = vunpack.c.h.s8.bf16 %v1673_v6 }
 0x21e   :  { %1596 = vmatprep.subr.bf16.mxu1 %v834_v10 }
 0x220   :  { %1556 = vmatpush2.bf16.msra.mxu0 %v769_v13  ;;  %v1686_v13 = vld [vmem:[#allocation7 + $0x78] sm:$0xff] }
 0x221   :  { %1597 = vmatpush2.bf16.msra.mxu1 %v833_v16  ;;  %1557 = vmatprep.subr.bf16.mxu0 %v766_v17  ;;  %v1682_v16 = vld [vmem:[#allocation7 + $0x58] sm:$0xff]  ;;  %v1676_v17 = vld [vmem:[#allocation7 + $0x28] sm:$0xff]  ;;  %v1717_v33 = vunpack.c.l.s8.bf16 %v1686_v13 }
 0x222   :  { %1598 = vmatprep.subr.bf16.mxu1 %v830_v18  ;;  %v1718_v18 = vunpack.c.h.s8.bf16 %v1686_v13  ;;  %v1710_v20 = vunpack.c.h.s8.bf16 %v1682_v16  ;;  %v1709_v37 = vunpack.c.l.s8.bf16 %v1682_v16 }
 0x224   :  { %1558 = vmatpush2.bf16.msra.mxu0 %v765_v42  ;;  %v1685_v42 = vld [vmem:[#allocation7 + $0x70] sm:$0xff] }
 0x225   :  { %1599 = vmatpush2.bf16.msra.mxu1 %v829_v22  ;;  %1559 = vmatprep.subr.bf16.mxu0 %v762_v59  ;;  %v1691_v22 = vunpack.c.l.s8.bf16 %v1673_v6  ;;  %v1620_v59 = vsub.s32 0, %v2044_v26  ;;  %v1716_v46 = vunpack.c.h.s8.bf16 %v1685_v42  ;;  %v1715_v8 = vunpack.c.l.s8.bf16 %v1685_v42  ;;  %v1679_v6 = vld [vmem:[#allocation7 + $0x40] sm:$0xff] }
 0x226   :  { %1600 = vmatprep.subr.bf16.mxu1 %v826_v62  ;;  %v1698_v62 = vunpack.c.h.s8.bf16 %v1676_v17  ;;  %v1628_v42 = vsub.s32 2, %v2044_v26 }
 0x228   :  { %1560 = vmatpush2.bf16.msra.mxu0 %v761_v25  ;;  %v1690_v25 = vunpack.c.h.s8.bf16 %v1672_v21 }
 0x229   :  { %1601 = vmatpush2.bf16.msra.mxu1 %v825_v28  ;;  %1561 = vmatprep.subr.bf16.mxu0 %v758_v56  ;;  %v1621_v28 = vrot.slane %v2195_v36, %v1620_v59  ;;  %v1697_v56 = vunpack.c.l.s8.bf16 %v1676_v17 }
 0x22a   :  { %1602 = vmatprep.subr.bf16.mxu1 %v822_v19  ;;  %v1708_v19 = vunpack.c.h.s8.bf16 %v1681_v51 }
 0x22b   :  { %v1638_v1 = vmul.f32 %v1621_v28, %v2188_v49 }
 0x22c   :  { %1562 = vmatpush2.bf16.msra.mxu0 %v757_v23  ;;  %v1646_v23 = vrot.slane %v2199_v52, %v1620_v59 }
 0x22d   :  { %1603 = vmatpush2.bf16.msra.mxu1 %v821_v14  ;;  %1563 = vmatprep.subr.bf16.mxu0 %v754_v45  ;;  %v1696_v14 = vunpack.c.h.s8.bf16 %v1675_v29  ;;  %v1671_v45 = vld [vmem:[#allocation7] sm:$0xff] }
 0x22e   :  { %1604 = vmatprep.subr.bf16.mxu1 %v818_v55  ;;  %v1707_v55 = vunpack.c.l.s8.bf16 %v1681_v51  ;;  %v1688_v30 = vunpack.c.h.s8.bf16 %v1671_v45  ;;  %v1663_v31 = vadd.f32 %v1646_v23, %v1638_v1  ;;  %v1687_v34 = vunpack.c.l.s8.bf16 %v1671_v45 }
 0x230   :  { %1564 = vmatpush2.bf16.msra.mxu0 %v753_v15  ;;  %v1667_v15 = vmax.f32 %v1663_v31, 0.0 }
 0x231   :  { %1605 = vmatpush2.bf16.msra.mxu1 %v817_v38  ;;  %1565 = vmatprep.subr.bf16.mxu0 %v750_v40  ;;  %v1684_v38 = vld [vmem:[#allocation7 + $0x68] sm:$0xff] }
 0x232   :  { %1606 = vmatprep.subr.bf16.mxu1 %v814_v43  ;;  %v1719_v49 = vpack.c.bf16 %v1667_v15, %v1667_v15  ;;  %v1714_v40 = vunpack.c.h.s8.bf16 %v1684_v38  ;;  %v1680_v43 = vld [vmem:[#allocation7 + $0x48] sm:$0xff]  ;;  %v1713_v35 = vunpack.c.l.s8.bf16 %v1684_v38 }
 0x233   :  { %v1706_v44 = vunpack.c.h.s8.bf16 %v1680_v43 }
 0x234   :  { %1566 = vmatpush2.bf16.msra.mxu0 %v749_v47 }
 0x235   :  { %1607 = vmatpush2.bf16.msra.mxu1 %v813_v48  ;;  %1833 = vmatprep.subr.bf16.mxu0 %v1702_v53 }
 0x236   :  { %1855 = vmatprep.subr.bf16.mxu1 %v1718_v18 }
 0x237   :  { %v1323_v61 = vpop.f32.mrf.mxu0  ;;  %1568 = vmatmul.mubr.bf16.vlgmr.msra.gmra.mxu0 %v2147_v39 }
 0x238   :  { %v1364_v63 = vpop.f32.mrf.mxu1  ;;  %1609 = vmatmul.mubr.bf16.vlgmr.msra.gmra.mxu1 %v2151_v50  ;;  %1834 = vmatpush3.bf16.msra.mxu0 %v1694_v24  ;;  %v1699_v50 = vunpack.c.l.s8.bf16 %v1677_v60 }
 0x239   :  { %v2204_v0 = vadd.f32 %v1364_v63, %v1323_v61  ;;  %1755 = vmatprep.mubr.bf16.mxu0 %v1720_v41  ;;  %v1325_v3 = vpop.f32.mrf.mxu0  ;;  %1835 = vmatprep.subr.bf16.mxu0 %v1701_v57  ;;  %v1705_v61 = vunpack.c.l.s8.bf16 %v1680_v43 }
 0x23a   :  { %v1366_v4 = vpop.f32.mrf.mxu1  ;;  %1856 = vmatpush3.bf16.msra.mxu1 %v1710_v20 }
 0x23b   :  { %v2206_v7 = vadd.f32 %v1366_v4, %v1325_v3  ;;  %v1327_v9 = vpop.f32.mrf.mxu0  ;;  %1857 = vmatprep.subr.bf16.mxu1 %v1717_v33 }
 0x23c   :  { %v1368_v10 = vpop.f32.mrf.mxu1  ;;  %1836 = vmatpush3.bf16.msra.mxu0 %v1693_v2  ;;  %v1683_v2 = vld [vmem:[#allocation7 + $0x60] sm:$0xff]  ;;  %v1704_v9 = vunpack.c.h.s8.bf16 %v1679_v6 }
 0x23d   :  { %v1328_v12 = vpop.f32.mrf.mxu0  ;;  %1837 = vmatprep.subr.bf16.mxu0 %v1700_v5  ;;  %v1712_v5 = vunpack.c.h.s8.bf16 %v1683_v2  ;;  %v1703_v10 = vunpack.c.l.s8.bf16 %v1679_v6 }
 0x23e   :  { %v1369_v39 = vpop.f32.mrf.mxu1  ;;  %1858 = vmatpush3.bf16.msra.mxu1 %v1709_v37 }
 0x23f   :  { %1859 = vmatprep.subr.bf16.mxu1 %v1716_v46  ;;  %v1629_v46 = vrot.slane %v2195_v36, %v1628_v42 }
 0x240   :  { %1838 = vmatpush3.bf16.msra.mxu0 %v1692_v11 }
 0x241   :  { %1839 = vmatprep.subr.bf16.mxu0 %v1699_v50 }
 0x242   :  { %1860 = vmatpush3.bf16.msra.mxu1 %v1708_v19 }
 0x243   :  { %1861 = vmatprep.subr.bf16.mxu1 %v1715_v8 }
 0x244   :  { %1840 = vmatpush3.bf16.msra.mxu0 %v1691_v22  ;;  %v1632_v22 = vsub.s32 3, %v2044_v26 }
 0x245   :  { %1841 = vmatprep.subr.bf16.mxu0 %v1698_v62 }
 0x246   :  { %1862 = vmatpush3.bf16.msra.mxu1 %v1707_v55  ;;  %v1633_v29 = vrot.slane %v2195_v36, %v1632_v22  ;;  %v1658_v26 = vrot.slane %v2199_v52, %v1632_v22 }
 0x247   :  { %1863 = vmatprep.subr.bf16.mxu1 %v1714_v40 }
 0x248   :  { %1842 = vmatpush3.bf16.msra.mxu0 %v1690_v25 }
 0x249   :  { %1843 = vmatprep.subr.bf16.mxu0 %v1697_v56  ;;  %v1654_v56 = vrot.slane %v2199_v52, %v1628_v42  ;;  %v1831_v52 = vld [vmem:[#allocation8 + $0x2] ss:$0 sm:$0xff] }
 0x24a   :  { %1864 = vmatpush3.bf16.msra.mxu1 %v1706_v44 }
 0x24b   :  { %1865 = vmatprep.subr.bf16.mxu1 %v1713_v35 }
 0x24c   :  { %1844 = vmatpush3.bf16.msra.mxu0 %v1689_v58 }
 0x24d   :  { %1845 = vmatprep.subr.bf16.mxu0 %v1696_v14 }
 0x24e   :  { %1866 = vmatpush3.bf16.msra.mxu1 %v1705_v61 }
 0x24f   :  { %1867 = vmatprep.subr.bf16.mxu1 %v1712_v5 }
 0x250   :  { %1846 = vmatpush3.bf16.msra.mxu0 %v1688_v30 }
 0x251   :  { %1847 = vmatprep.subr.bf16.mxu0 %v1695_v32 }
 0x252   :  { %1868 = vmatpush3.bf16.msra.mxu1 %v1704_v9 }
 0x254   :  { %1848 = vmatpush3.bf16.msra.mxu0 %v1687_v34 }
 0x257   :  { %1756 = vmatmul.mubr.bf16.vlgmr.msra.gmra.mxu0 %v1719_v49 }
 0x277   :  { %v1405_v27 = vpop.f32.mrf.mxu0 }
 0x278   :  { %v1446_v47 = vpop.f32.mrf.mxu1  ;;  %v1406_v48 = vadd.f32 %v1405_v27, %v2204_v0  ;;  %v1711_v0 = vunpack.c.l.s8.bf16 %v1683_v2 }
 0x279   :  { %v1407_v53 = vpop.f32.mrf.mxu0 }
 0x27a   :  { %v1448_v54 = vpop.f32.mrf.mxu1  ;;  %v1447_v24 = vadd.f32 %v1446_v47, %v1406_v48  ;;  %v1408_v57 = vadd.f32 %v1407_v53, %v2206_v7  ;;  %1869 = vmatprep.subr.bf16.mxu1 %v1711_v0 }
 0x27b   :  { %v1409_v41 = vpop.f32.mrf.mxu0  ;;  %1870 = vmatpush3.bf16.msra.mxu1 %v1703_v10 }
 0x27c   :  { %v1450_v60 = vpop.f32.mrf.mxu1  ;;  %v1449_v63 = vadd.f32 %v1448_v54, %v1408_v57 }
 0x27d   :  { %v1410_v3 = vpop.f32.mrf.mxu0 }
 0x27e   :  { %v1451_v4 = vpop.f32.mrf.mxu1 }
 0x2b7   :  { %v1487_v11 = vpop.f32.mrf.mxu0 }
 0x2b8   :  { %v1528_v7 = vpop.f32.mrf.mxu1  ;;  %v1488_v12 = vadd.f32 %v1487_v11, %v1447_v24  ;;  %v1832_v24 = vld [vmem:[#allocation8 + $0x3] ss:$0 sm:$0xff] }
 0x2b9   :  { %v1489_v39 = vpop.f32.mrf.mxu0 }
 0x2ba   :  { %v1530_v50 = vpop.f32.mrf.mxu1  ;;  %v1529_v13 = vadd.f32 %v1528_v7, %v1488_v12  ;;  %v1490_v33 = vadd.f32 %v1489_v39, %v1449_v63 }
 0x2bb   :  { %v1491_v16 = vpop.f32.mrf.mxu0 }
 0x2bc   :  { %v1532_v17 = vpop.f32.mrf.mxu1  ;;  %v1531_v21 = vadd.f32 %v1530_v50, %v1490_v33 }
 0x2bd   :  { %v1492_v18 = vpop.f32.mrf.mxu0 }
 0x2be   :  { %v1533_v20 = vpop.f32.mrf.mxu1 }
 0x2f7   :  { %v1569_v59 = vpop.f32.mrf.mxu0 }
 0x2f8   :  { %v1610_v62 = vpop.f32.mrf.mxu1  ;;  %v1570_v37 = vadd.f32 %v1569_v59, %v1529_v13 }
 0x2f9   :  { %v1571_v51 = vpop.f32.mrf.mxu0 }
 0x2fa   :  { %v1612_v25 = vpop.f32.mrf.mxu1  ;;  %v1611_v28 = vadd.f32 %v1610_v62, %v1570_v37  ;;  %v1572_v19 = vadd.f32 %v1571_v51, %v1531_v21 }
 0x2fb   :  { %v1573_v8 = vpop.f32.mrf.mxu0 }
 0x2fc   :  { %v1614_v58 = vpop.f32.mrf.mxu1  ;;  %v1640_v1 = vmul.f32 %v1629_v46, %v1611_v28  ;;  %v1613_v23 = vadd.f32 %v1612_v25, %v1572_v19 }
 0x2fd   :  { %v1574_v14 = vpop.f32.mrf.mxu0 }
 0x2fe   :  { %v1615_v45 = vpop.f32.mrf.mxu1  ;;  %v1665_v55 = vadd.f32 %v1654_v56, %v1640_v1  ;;  %v1641_v30 = vmul.f32 %v1633_v29, %v1613_v23 }
 0x300   :  { %v1666_v31 = vadd.f32 %v1658_v26, %v1641_v30  ;;  %v1669_v32 = vmax.f32 %v1665_v55, 0.0 }
 0x302   :  { %v1670_v34 = vmax.f32 %v1666_v31, 0.0  ;;  %v1721_v49 = vpack.c.bf16 %v1669_v32, %v1669_v32 }
 0x304   :  { %v1722_v15 = vpack.c.bf16 %v1670_v34, %v1670_v34 }
 0x306   :  { %1795 = vmatprep.mubr.bf16.mxu1 %v1722_v15 }
 0x307   :  { %1796 = vmatmul.mubr.bf16.vlgmr.msra.gmra.mxu1 %v1721_v49 }
 0x317   :  { %v1849_v38 = vpop.f32.mrf.mxu0 }
 0x319   :  { %v1850_v40 = vpop.f32.mrf.mxu0 }
 0x31a   :  { %v1851_v36 = vadd.f32 %v1850_v40, %v1849_v38 }
 0x31b   :  { %v1852_v43 = vpop.f32.mrf.mxu0 }
 0x31d   :  { %v1853_v44 = vpop.f32.mrf.mxu0 }
 0x3c7   :  { %v1871_v27 = vpop.f32.mrf.mxu1 }
 0x3c9   :  { %v1872_v47 = vpop.f32.mrf.mxu1 }
 0x3ca   :  { %v1873_v48 = vadd.f32 %v1872_v47, %v1871_v27 }
 0x3cb   :  { %v1874_v53 = vpop.f32.mrf.mxu1 }
 0x3cc   :  { %v1798_v54 = vadd.f32 %v1873_v48, %v1851_v36 }
 0x3cd   :  { %v1875_v35 = vpop.f32.mrf.mxu1 }
 0x3ce   :  { %v1807_v57 = vmul.f32 %v1831_v52, %v1798_v54 }
 0x3d0   :  { %v1812_v41 = vadd.f32 %v1832_v24, %v1807_v57 }
 0x3d2   :  { %1813 = vst [vmem:[#allocation10] sm:$0x3] %v1812_v41 }
 0x3d3   :  { %1980 = shalt.err (!%p1977_p10)
}
 0x3d4   :  { %1823 = dma.vmem_to_hbm [thread:$0]  %s1821_s3, 32, %s2227_s4, [#allocation4]  }
 0x3d5   :  { %1995 = dma.done.wait [#allocation4], 32  }
 0x3d6   :  { %1996 = vsyncadd [#allocation4], 4294967264 }
 0x3d7   :  { %1827 = vsyncpa [#allocation3], 1 }
 0x3d8   :  { %1828 = vsyncpa [#allocation6], 1 }
 0x3d9   :  { %1829 = vsyncpa [#allocation9], 1 }
 0x3da   :  { %1830 = vsyncpa [#allocation4], 1 }

</bundles_post_ra>
